<compile_context>
chip_gen: v7x
topology: tpu7x:2x2x1
jax: 0.10.0
libtpu: 0.0.40
codegen_flags: <defaults>
</compile_context>

<pallas_src>
import jax
import jax.numpy as jnp
from jax import lax
from jax.experimental import pallas as pl
from jax.experimental.pallas import tpu as pltpu


# ----------------------------------------------------------------------------
# Fused kernel: one batch element per grid step.
# ----------------------------------------------------------------------------
def _make_fused_kernel(layer_io, Kh, Kw, Tt, Ts, ph, pw):
    """layer_io: list of (cin_l, growth_l) for each DenseNet conv layer."""
    n_layers = len(layer_io)

    def pad_grid(v):
        # Zero-pad a (Tt, Ts, C) value: causal pad (ph rows, top) on the target
        # axis, symmetric pad (pw cols) on the source axis.
        c = v.shape[-1]
        if pw:
            zc = jnp.zeros((v.shape[0], pw, c), v.dtype)
            v = jnp.concatenate([zc, v, zc], axis=1)
        if ph:
            zr = jnp.zeros((ph, v.shape[1], c), v.dtype)
            v = jnp.concatenate([zr, v], axis=0)
        return v                                    # (Tt+ph, Ts+2pw, C)

    def kernel(*refs):
        lens_ref, src_ref, trg_ref = refs[0], refs[1], refs[2]
        conv_refs = refs[3:3 + 2 * n_layers]        # w0, b0, w1, b1, ...
        agg_w_ref, agg_b_ref, pred_w_ref, pred_b_ref, o_ref = refs[3 + 2 * n_layers:]

        b = pl.program_id(0)

        # Joint source x target grid: X[t, s] = concat(src_emb[s], trg_emb[t]).
        src_e = src_ref[0].astype(jnp.float32)      # (Ts, Es)
        trg_e = trg_ref[0].astype(jnp.float32)      # (Tt, Et)
        src_g = jnp.broadcast_to(src_e[None, :, :], (Tt, Ts, src_e.shape[-1]))
        trg_g = jnp.broadcast_to(trg_e[:, None, :], (Tt, Ts, trg_e.shape[-1]))
        xp = pad_grid(jnp.concatenate([src_g, trg_g], axis=-1))  # (Tt+ph, Ts+2pw, C0)

        # DenseNet: each masked conv is ONE im2col matmul on the MXU (bf16 in,
        # f32 accumulate); channel-concat growth stays resident on-chip.
        for l, (cin, g) in enumerate(layer_io):
            w_ref = conv_refs[2 * l]                # (Kh*Kw*cin, g)  bf16
            b_ref = conv_refs[2 * l + 1]            # (1, g)          f32
            taps = [xp[dy:dy + Tt, dx:dx + Ts, :]
                    for dy in range(Kh) for dx in range(Kw)]
            patch = jnp.concatenate(taps, axis=-1).reshape(Tt * Ts, Kh * Kw * cin)
            acc = jnp.dot(patch.astype(jnp.bfloat16), w_ref[...],
                          preferred_element_type=jnp.float32)
            y = jnp.maximum(acc + b_ref[...], 0.0).reshape(Tt, Ts, g)
            xp = jnp.concatenate([xp, pad_grid(y)], axis=-1)

        # Aggregator ('max' mode): length-masked max over the source axis,
        # linear projection, then prediction Linear + log_softmax (all fused).
        h = xp[ph:ph + Tt, pw:pw + Ts, :]                        # (Tt, Ts, Ctot)
        s_idx = lax.broadcasted_iota(jnp.int32, (Ts, 1), 0)      # source idx only
        # NOTE: a src_length of 0 would give -inf pooled rows (same as the
        # original masked max); the NMT data pipeline never produces it.
        neg = jnp.where(s_idx < lens_ref[b], 0.0, -jnp.inf).astype(jnp.float32)
        pooled = jnp.max(h + neg[None, :, :], axis=1)            # (Tt, Ctot)
        z = jnp.dot(pooled.astype(jnp.bfloat16), agg_w_ref[...],
                    preferred_element_type=jnp.float32) + agg_b_ref[...]
        logits = jnp.dot(z.astype(jnp.bfloat16), pred_w_ref[...],
                         preferred_element_type=jnp.float32) + pred_b_ref[...]
        m = jnp.max(logits, axis=-1, keepdims=True)
        sh = logits - m
        lse = jnp.log(jnp.sum(jnp.exp(sh), axis=-1, keepdims=True))
        o_ref[...] = (sh - lse).reshape(1, Tt, logits.shape[-1]).astype(o_ref.dtype)

    return kernel


# ----------------------------------------------------------------------------
# Wrapper: embedding lookup in XLA, everything else in the fused kernel.
# ----------------------------------------------------------------------------
def pervasive_forward(params, src_labels, trg_labels, src_lengths):
    src_emb = params["src_emb"][src_labels].astype(jnp.bfloat16)   # (B, Ts, Es)
    trg_emb = params["trg_emb"][trg_labels].astype(jnp.bfloat16)   # (B, Tt, Et)
    B, Ts, Es = src_emb.shape
    _, Tt, Et = trg_emb.shape
    c0 = Es + Et

    conv_layers = params["conv_layers"]
    w0 = conv_layers[0][0]
    Kh, Kw = w0.shape[0], w0.shape[1]
    ph, pw = Kh - 1, Kw // 2                      # causal / 'same' padding

    layer_io = []
    conv_ops = []
    conv_specs = []
    c = c0
    for (w, b_) in conv_layers:
        cin, g = w.shape[2], w.shape[3]
        layer_io.append((cin, g))
        w2 = w.reshape(Kh * Kw * cin, g).astype(jnp.bfloat16)      # im2col layout
        b2 = b_.reshape(1, g).astype(jnp.float32)
        conv_ops += [w2, b2]
        conv_specs += [pl.BlockSpec(w2.shape, lambda i, lens: (0, 0)),
                       pl.BlockSpec(b2.shape, lambda i, lens: (0, 0))]
        c += g

    agg_w = params["agg_w"].astype(jnp.bfloat16)
    agg_b = params["agg_b"].reshape(1, -1).astype(jnp.float32)
    pred_w = params["pred_w"].astype(jnp.bfloat16)
    pred_b = params["pred_b"].reshape(1, -1).astype(jnp.float32)
    V = pred_w.shape[1]

    kernel = _make_fused_kernel(layer_io, Kh, Kw, Tt, Ts, ph, pw)

    return pl.pallas_call(
        kernel,
        out_shape=jax.ShapeDtypeStruct((B, Tt, V), jnp.float32),
        grid_spec=pltpu.PrefetchScalarGridSpec(
            num_scalar_prefetch=1,                 # src_lengths -> SMEM
            grid=(B,),
            in_specs=[
                pl.BlockSpec((1, Ts, Es), lambda i, lens: (i, 0, 0)),
                pl.BlockSpec((1, Tt, Et), lambda i, lens: (i, 0, 0)),
                *conv_specs,
                pl.BlockSpec(agg_w.shape, lambda i, lens: (0, 0)),
                pl.BlockSpec(agg_b.shape, lambda i, lens: (0, 0)),
                pl.BlockSpec(pred_w.shape, lambda i, lens: (0, 0)),
                pl.BlockSpec(pred_b.shape, lambda i, lens: (0, 0)),
            ],
            out_specs=pl.BlockSpec((1, Tt, V), lambda i, lens: (i, 0, 0)),
        ),
        compiler_params=pltpu.CompilerParams(
            dimension_semantics=("parallel",),     # even B -> both v7x TCs busy
        ),
    )(src_lengths.astype(jnp.int32), src_emb, trg_emb, *conv_ops,
      agg_w, agg_b, pred_w, pred_b)


# ----------------------------------------------------------------------------
# Pure-JAX reference (same math incl. bf16 cast points, XLA conv) for checking.
# ----------------------------------------------------------------------------
def reference_forward(params, src_labels, trg_labels, src_lengths):
    f32 = jnp.float32
    src_emb = params["src_emb"][src_labels].astype(jnp.bfloat16).astype(f32)
    trg_emb = params["trg_emb"][trg_labels].astype(jnp.bfloat16).astype(f32)
    B, Ts, Es = src_emb.shape
    _, Tt, Et = trg_emb.shape
    src_g = jnp.broadcast_to(src_emb[:, None, :, :], (B, Tt, Ts, Es))
    trg_g = jnp.broadcast_to(trg_emb[:, :, None, :], (B, Tt, Ts, Et))
    feats = jnp.concatenate([src_g, trg_g], axis=-1)
    for w, b in params["conv_layers"]:
        Kh, Kw = w.shape[0], w.shape[1]
        xp = jnp.pad(feats, ((0, 0), (Kh - 1, 0), (Kw // 2, Kw // 2), (0, 0)))
        y = lax.conv_general_dilated(
            xp.astype(jnp.bfloat16), w.astype(jnp.bfloat16), (1, 1), "VALID",
            dimension_numbers=("NHWC", "HWIO", "NHWC"),
            preferred_element_type=f32)
        y = jnp.maximum(y + b, 0.0)
        feats = jnp.concatenate([feats, y], axis=-1)
    s_idx = jnp.arange(Ts)[None, None, :, None]
    masked = jnp.where(s_idx < src_lengths[:, None, None, None], feats, -jnp.inf)
    pooled = jnp.max(masked, axis=2)                               # (B, Tt, C)
    z = jnp.dot(pooled.astype(jnp.bfloat16), params["agg_w"].astype(jnp.bfloat16),
                preferred_element_type=f32) + params["agg_b"]
    logits = jnp.dot(z.astype(jnp.bfloat16), params["pred_w"].astype(jnp.bfloat16),
                     preferred_element_type=f32) + params["pred_b"]
    return jax.nn.log_softmax(logits, axis=2)


if __name__ == "__main__":
    # Small shapes consistent with the module's forward.
    B, Ts, Tt = 2, 8, 8
    Es = Et = 16                      # encoder / decoder embedding dims
    K = 3                             # params['network']['kernels'][0]
    Kh = K // 2 + 1                   # causal kernel height (masked conv)
    growth, n_layers = 16, 2          # DenseNet growth / depth
    src_vocab, trg_vocab = 50, 128    # trg vocab kept lane-dense (>=128)
    D = 32                            # decoder input_dim (aggregator proj)

    key = jax.random.PRNGKey(0)
    ks = jax.random.split(key, 10)

    def rnd(k, shape, scale=0.1):
        return (scale * jax.random.normal(k, shape)).astype(jnp.float32)

    src_emb = rnd(ks[0], (src_vocab, Es)).at[0].set(0.0)   # padding_idx = 0
    trg_emb = rnd(ks[1], (trg_vocab, Et)).at[0].set(0.0)

    conv_layers = []
    cin = Es + Et
    wk = jax.random.split(ks[2], n_layers)
    for li in range(n_layers):
        conv_layers.append((rnd(wk[li], (Kh, K, cin, growth)),
                            jnp.zeros((growth,), jnp.float32)))
        cin += growth                                       # DenseNet concat

    params = dict(
        src_emb=src_emb, trg_emb=trg_emb, conv_layers=conv_layers,
        agg_w=rnd(ks[3], (cin, D)), agg_b=jnp.zeros((D,), jnp.float32),
        pred_w=rnd(ks[4], (D, trg_vocab)),
        pred_b=jnp.zeros((trg_vocab,), jnp.float32),
    )

    src_labels = jax.random.randint(ks[5], (B, Ts), 1, src_vocab)
    trg_labels = jax.random.randint(ks[6], (B, Tt), 1, trg_vocab)
    src_lengths = jnp.array([Ts, Ts - 3], dtype=jnp.int32)

    out = jax.jit(pervasive_forward)(params, src_labels, trg_labels, src_lengths)
    out = jax.block_until_ready(out)

    ref = reference_forward(params, src_labels, trg_labels, src_lengths)
    assert out.shape == (B, Tt, trg_vocab)
    assert bool(jnp.all(jnp.isfinite(out)))
    assert bool(jnp.allclose(out, ref, atol=2e-3, rtol=2e-3)), "mismatch vs reference"
    print("KERNEL_OK")
</pallas_src>

<mosaic_0001>
module attributes {stable_mosaic.version = 11 : i64} {
  func.func @kernel(%arg0: i32, %arg1: memref<2xi32, #tpu.memory_space<smem>>, %arg2: memref<1x8x16xbf16, #tpu.memory_space<vmem>>, %arg3: memref<1x8x16xbf16, #tpu.memory_space<vmem>>, %arg4: memref<192x16xbf16, #tpu.memory_space<vmem>>, %arg5: memref<1x16xf32, #tpu.memory_space<vmem>>, %arg6: memref<288x16xbf16, #tpu.memory_space<vmem>>, %arg7: memref<1x16xf32, #tpu.memory_space<vmem>>, %arg8: memref<64x32xbf16, #tpu.memory_space<vmem>>, %arg9: memref<1x32xf32, #tpu.memory_space<vmem>>, %arg10: memref<32x128xbf16, #tpu.memory_space<vmem>>, %arg11: memref<1x128xf32, #tpu.memory_space<vmem>>, %arg12: memref<1x8x128xf32, #tpu.memory_space<vmem>>) attributes {dimension_semantics = [#tpu.dimension_semantics<parallel>], iteration_bounds = array<i64: 2>, scalar_prefetch = 1 : i64, scratch_operands = 0 : i64, tpu.core_type = #tpu.core_type<tc>, window_params = [{transform_indices = @transform_0, window_bounds = array<i64: 1, 8, 16>}, {transform_indices = @transform_1, window_bounds = array<i64: 1, 8, 16>}, {pipeline_mode = #tpu.pipeline_mode<synchronous>, transform_indices = @transform_2, window_bounds = array<i64: 192, 16>}, {pipeline_mode = #tpu.pipeline_mode<synchronous>, transform_indices = @transform_3, window_bounds = array<i64: 1, 16>}, {pipeline_mode = #tpu.pipeline_mode<synchronous>, transform_indices = @transform_4, window_bounds = array<i64: 288, 16>}, {pipeline_mode = #tpu.pipeline_mode<synchronous>, transform_indices = @transform_5, window_bounds = array<i64: 1, 16>}, {pipeline_mode = #tpu.pipeline_mode<synchronous>, transform_indices = @transform_6, window_bounds = array<i64: 64, 32>}, {pipeline_mode = #tpu.pipeline_mode<synchronous>, transform_indices = @transform_7, window_bounds = array<i64: 1, 32>}, {pipeline_mode = #tpu.pipeline_mode<synchronous>, transform_indices = @transform_8, window_bounds = array<i64: 32, 128>}, {pipeline_mode = #tpu.pipeline_mode<synchronous>, transform_indices = @transform_9, window_bounds = array<i64: 1, 128>}, {transform_indices = @transform_10, window_bounds = array<i64: 1, 8, 128>}]} {
    %c0 = arith.constant 0 : index
    %c0_0 = arith.constant 0 : index
    %c0_1 = arith.constant 0 : index
    %0 = vector.load %arg2[%c0, %c0_0, %c0_1] : memref<1x8x16xbf16, #tpu.memory_space<vmem>>, vector<1x8x16xbf16>
    %1 = vector.shape_cast %0 : vector<1x8x16xbf16> to vector<8x16xbf16>
    %2 = arith.extf %1 : vector<8x16xbf16> to vector<8x16xf32>
    %c0_2 = arith.constant 0 : index
    %c0_3 = arith.constant 0 : index
    %c0_4 = arith.constant 0 : index
    %3 = vector.load %arg3[%c0_2, %c0_3, %c0_4] : memref<1x8x16xbf16, #tpu.memory_space<vmem>>, vector<1x8x16xbf16>
    %4 = vector.shape_cast %3 : vector<1x8x16xbf16> to vector<8x16xbf16>
    %5 = arith.extf %4 : vector<8x16xbf16> to vector<8x16xf32>
    %6 = vector.shape_cast %2 : vector<8x16xf32> to vector<1x8x16xf32>
    %7 = vector.shape_cast %6 : vector<1x8x16xf32> to vector<1x8x16xf32>
    %8 = vector.broadcast %7 : vector<1x8x16xf32> to vector<8x8x16xf32>
    %9 = vector.shape_cast %5 : vector<8x16xf32> to vector<8x1x16xf32>
    %10 = vector.shape_cast %9 : vector<8x1x16xf32> to vector<8x1x16xf32>
    %11 = vector.broadcast %10 : vector<8x1x16xf32> to vector<8x8x16xf32>
    %12 = tpu.concatenate %8, %11 in 2 : vector<8x8x16xf32>, vector<8x8x16xf32> -> vector<8x8x32xf32>
    %cst = arith.constant 0.000000e+00 : f32
    %13 = vector.broadcast %cst : f32 to vector<8x1x32xf32>
    %14 = tpu.concatenate %13, %12, %13 in 1 : vector<8x1x32xf32>, vector<8x8x32xf32>, vector<8x1x32xf32> -> vector<8x10x32xf32>
    %cst_5 = arith.constant 0.000000e+00 : f32
    %15 = vector.broadcast %cst_5 : f32 to vector<1x10x32xf32>
    %16 = tpu.concatenate %15, %14 in 0 : vector<1x10x32xf32>, vector<8x10x32xf32> -> vector<9x10x32xf32>
    %17 = vector.extract_strided_slice %16 {offsets = [0, 0, 0], sizes = [8, 8, 32], strides = [1, 1, 1]} : vector<9x10x32xf32> to vector<8x8x32xf32>
    %18 = vector.extract_strided_slice %16 {offsets = [0, 1, 0], sizes = [8, 8, 32], strides = [1, 1, 1]} : vector<9x10x32xf32> to vector<8x8x32xf32>
    %19 = vector.extract_strided_slice %16 {offsets = [0, 2, 0], sizes = [8, 8, 32], strides = [1, 1, 1]} : vector<9x10x32xf32> to vector<8x8x32xf32>
    %20 = vector.extract_strided_slice %16 {offsets = [1, 0, 0], sizes = [8, 8, 32], strides = [1, 1, 1]} : vector<9x10x32xf32> to vector<8x8x32xf32>
    %21 = vector.extract_strided_slice %16 {offsets = [1, 1, 0], sizes = [8, 8, 32], strides = [1, 1, 1]} : vector<9x10x32xf32> to vector<8x8x32xf32>
    %22 = vector.extract_strided_slice %16 {offsets = [1, 2, 0], sizes = [8, 8, 32], strides = [1, 1, 1]} : vector<9x10x32xf32> to vector<8x8x32xf32>
    %23 = tpu.concatenate %17, %18, %19, %20, %21, %22 in 2 : vector<8x8x32xf32>, vector<8x8x32xf32>, vector<8x8x32xf32>, vector<8x8x32xf32>, vector<8x8x32xf32>, vector<8x8x32xf32> -> vector<8x8x192xf32>
    %24 = vector.shape_cast %23 : vector<8x8x192xf32> to vector<64x192xf32>
    %25 = arith.truncf %24 : vector<64x192xf32> to vector<64x192xbf16>
    %c0_6 = arith.constant 0 : index
    %c0_7 = arith.constant 0 : index
    %26 = vector.load %arg4[%c0_6, %c0_7] : memref<192x16xbf16, #tpu.memory_space<vmem>>, vector<192x16xbf16>
    %cst_8 = arith.constant dense<0.000000e+00> : vector<64x16xf32>
    %27 = tpu.matmul %25, %26, %cst_8 {dimension_numbers = #tpu.dot_dimension_numbers<[1], [0], [0], [1], [0, 0, 1, 1], [], []>} : vector<64x192xbf16>, vector<192x16xbf16>, vector<64x16xf32> -> vector<64x16xf32>
    %c0_9 = arith.constant 0 : index
    %c0_10 = arith.constant 0 : index
    %28 = vector.load %arg5[%c0_9, %c0_10] : memref<1x16xf32, #tpu.memory_space<vmem>>, vector<1x16xf32>
    %29 = vector.broadcast %28 : vector<1x16xf32> to vector<64x16xf32>
    %30 = arith.addf %27, %29 : vector<64x16xf32>
    %cst_11 = arith.constant 0.000000e+00 : f32
    %31 = vector.broadcast %cst_11 : f32 to vector<64x16xf32>
    %32 = arith.maximumf %30, %31 : vector<64x16xf32>
    %33 = vector.shape_cast %32 : vector<64x16xf32> to vector<8x8x16xf32>
    %cst_12 = arith.constant 0.000000e+00 : f32
    %34 = vector.broadcast %cst_12 : f32 to vector<8x1x16xf32>
    %35 = tpu.concatenate %34, %33, %34 in 1 : vector<8x1x16xf32>, vector<8x8x16xf32>, vector<8x1x16xf32> -> vector<8x10x16xf32>
    %cst_13 = arith.constant 0.000000e+00 : f32
    %36 = vector.broadcast %cst_13 : f32 to vector<1x10x16xf32>
    %37 = tpu.concatenate %36, %35 in 0 : vector<1x10x16xf32>, vector<8x10x16xf32> -> vector<9x10x16xf32>
    %38 = tpu.concatenate %16, %37 in 2 : vector<9x10x32xf32>, vector<9x10x16xf32> -> vector<9x10x48xf32>
    %39 = vector.extract_strided_slice %38 {offsets = [0, 0, 0], sizes = [8, 8, 48], strides = [1, 1, 1]} : vector<9x10x48xf32> to vector<8x8x48xf32>
    %40 = vector.extract_strided_slice %38 {offsets = [0, 1, 0], sizes = [8, 8, 48], strides = [1, 1, 1]} : vector<9x10x48xf32> to vector<8x8x48xf32>
    %41 = vector.extract_strided_slice %38 {offsets = [0, 2, 0], sizes = [8, 8, 48], strides = [1, 1, 1]} : vector<9x10x48xf32> to vector<8x8x48xf32>
    %42 = vector.extract_strided_slice %38 {offsets = [1, 0, 0], sizes = [8, 8, 48], strides = [1, 1, 1]} : vector<9x10x48xf32> to vector<8x8x48xf32>
    %43 = vector.extract_strided_slice %38 {offsets = [1, 1, 0], sizes = [8, 8, 48], strides = [1, 1, 1]} : vector<9x10x48xf32> to vector<8x8x48xf32>
    %44 = vector.extract_strided_slice %38 {offsets = [1, 2, 0], sizes = [8, 8, 48], strides = [1, 1, 1]} : vector<9x10x48xf32> to vector<8x8x48xf32>
    %45 = tpu.concatenate %39, %40, %41, %42, %43, %44 in 2 : vector<8x8x48xf32>, vector<8x8x48xf32>, vector<8x8x48xf32>, vector<8x8x48xf32>, vector<8x8x48xf32>, vector<8x8x48xf32> -> vector<8x8x288xf32>
    %46 = vector.shape_cast %45 : vector<8x8x288xf32> to vector<64x288xf32>
    %47 = arith.truncf %46 : vector<64x288xf32> to vector<64x288xbf16>
    %c0_14 = arith.constant 0 : index
    %c0_15 = arith.constant 0 : index
    %48 = vector.load %arg6[%c0_14, %c0_15] : memref<288x16xbf16, #tpu.memory_space<vmem>>, vector<288x16xbf16>
    %cst_16 = arith.constant dense<0.000000e+00> : vector<64x16xf32>
    %49 = tpu.matmul %47, %48, %cst_16 {dimension_numbers = #tpu.dot_dimension_numbers<[1], [0], [0], [1], [0, 0, 1, 1], [], []>} : vector<64x288xbf16>, vector<288x16xbf16>, vector<64x16xf32> -> vector<64x16xf32>
    %c0_17 = arith.constant 0 : index
    %c0_18 = arith.constant 0 : index
    %50 = vector.load %arg7[%c0_17, %c0_18] : memref<1x16xf32, #tpu.memory_space<vmem>>, vector<1x16xf32>
    %51 = vector.broadcast %50 : vector<1x16xf32> to vector<64x16xf32>
    %52 = arith.addf %49, %51 : vector<64x16xf32>
    %cst_19 = arith.constant 0.000000e+00 : f32
    %53 = vector.broadcast %cst_19 : f32 to vector<64x16xf32>
    %54 = arith.maximumf %52, %53 : vector<64x16xf32>
    %55 = vector.shape_cast %54 : vector<64x16xf32> to vector<8x8x16xf32>
    %cst_20 = arith.constant 0.000000e+00 : f32
    %56 = vector.broadcast %cst_20 : f32 to vector<8x1x16xf32>
    %57 = tpu.concatenate %56, %55, %56 in 1 : vector<8x1x16xf32>, vector<8x8x16xf32>, vector<8x1x16xf32> -> vector<8x10x16xf32>
    %cst_21 = arith.constant 0.000000e+00 : f32
    %58 = vector.broadcast %cst_21 : f32 to vector<1x10x16xf32>
    %59 = tpu.concatenate %58, %57 in 0 : vector<1x10x16xf32>, vector<8x10x16xf32> -> vector<9x10x16xf32>
    %60 = tpu.concatenate %38, %59 in 2 : vector<9x10x48xf32>, vector<9x10x16xf32> -> vector<9x10x64xf32>
    %61 = vector.extract_strided_slice %60 {offsets = [1, 1, 0], sizes = [8, 8, 64], strides = [1, 1, 1]} : vector<9x10x64xf32> to vector<8x8x64xf32>
    %62 = tpu.iota {dimensions = array<i32: 0>} : vector<8x1xi32>
    %63 = arith.index_cast %arg0 : i32 to index
    %64 = memref.load %arg1[%63] : memref<2xi32, #tpu.memory_space<smem>>
    %65 = vector.broadcast %64 : i32 to vector<8x1xi32>
    %66 = arith.cmpi slt, %62, %65 : vector<8x1xi32>
    %cst_22 = arith.constant 0.000000e+00 : f32
    %cst_23 = arith.constant 0xFF800000 : f32
    %67 = vector.broadcast %cst_22 : f32 to vector<8x1xf32>
    %68 = vector.broadcast %cst_23 : f32 to vector<8x1xf32>
    %69 = arith.select %66, %67, %68 : vector<8x1xi1>, vector<8x1xf32>
    %70 = vector.shape_cast %69 : vector<8x1xf32> to vector<1x8x1xf32>
    %71 = vector.broadcast %70 : vector<1x8x1xf32> to vector<8x8x64xf32>
    %72 = arith.addf %61, %71 : vector<8x8x64xf32>
    %cst_24 = arith.constant dense<0xFF800000> : vector<8x64xf32>
    %73 = vector.multi_reduction <maximumf>, %72, %cst_24 [1] : vector<8x8x64xf32> to vector<8x64xf32>
    %74 = arith.truncf %73 : vector<8x64xf32> to vector<8x64xbf16>
    %c0_25 = arith.constant 0 : index
    %c0_26 = arith.constant 0 : index
    %75 = vector.load %arg8[%c0_25, %c0_26] : memref<64x32xbf16, #tpu.memory_space<vmem>>, vector<64x32xbf16>
    %cst_27 = arith.constant dense<0.000000e+00> : vector<8x32xf32>
    %76 = tpu.matmul %74, %75, %cst_27 {dimension_numbers = #tpu.dot_dimension_numbers<[1], [0], [0], [1], [0, 0, 1, 1], [], []>} : vector<8x64xbf16>, vector<64x32xbf16>, vector<8x32xf32> -> vector<8x32xf32>
    %c0_28 = arith.constant 0 : index
    %c0_29 = arith.constant 0 : index
    %77 = vector.load %arg9[%c0_28, %c0_29] : memref<1x32xf32, #tpu.memory_space<vmem>>, vector<1x32xf32>
    %78 = vector.broadcast %77 : vector<1x32xf32> to vector<8x32xf32>
    %79 = arith.addf %76, %78 : vector<8x32xf32>
    %80 = arith.truncf %79 : vector<8x32xf32> to vector<8x32xbf16>
    %c0_30 = arith.constant 0 : index
    %c0_31 = arith.constant 0 : index
    %81 = vector.load %arg10[%c0_30, %c0_31] : memref<32x128xbf16, #tpu.memory_space<vmem>>, vector<32x128xbf16>
    %cst_32 = arith.constant dense<0.000000e+00> : vector<8x128xf32>
    %82 = tpu.matmul %80, %81, %cst_32 {dimension_numbers = #tpu.dot_dimension_numbers<[1], [0], [0], [1], [0, 0, 1, 1], [], []>} : vector<8x32xbf16>, vector<32x128xbf16>, vector<8x128xf32> -> vector<8x128xf32>
    %c0_33 = arith.constant 0 : index
    %c0_34 = arith.constant 0 : index
    %83 = vector.load %arg11[%c0_33, %c0_34] : memref<1x128xf32, #tpu.memory_space<vmem>>, vector<1x128xf32>
    %84 = vector.broadcast %83 : vector<1x128xf32> to vector<8x128xf32>
    %85 = arith.addf %82, %84 : vector<8x128xf32>
    %cst_35 = arith.constant dense<0xFF800000> : vector<8xf32>
    %86 = vector.multi_reduction <maximumf>, %85, %cst_35 [1] : vector<8x128xf32> to vector<8xf32>
    %87 = vector.shape_cast %86 : vector<8xf32> to vector<8x1xf32>
    %88 = vector.broadcast %87 : vector<8x1xf32> to vector<8x128xf32>
    %89 = arith.subf %85, %88 : vector<8x128xf32>
    %90 = math.exp %89 : vector<8x128xf32>
    %cst_36 = arith.constant dense<0.000000e+00> : vector<8xf32>
    %91 = vector.multi_reduction <add>, %90, %cst_36 [1] : vector<8x128xf32> to vector<8xf32>
    %92 = vector.shape_cast %91 : vector<8xf32> to vector<8x1xf32>
    %93 = math.log %92 : vector<8x1xf32>
    %94 = vector.broadcast %93 : vector<8x1xf32> to vector<8x128xf32>
    %95 = arith.subf %89, %94 : vector<8x128xf32>
    %96 = vector.shape_cast %95 : vector<8x128xf32> to vector<1x8x128xf32>
    %c0_37 = arith.constant 0 : index
    %c0_38 = arith.constant 0 : index
    %c0_39 = arith.constant 0 : index
    %97 = vector.load %arg12[%c0_37, %c0_38, %c0_39] : memref<1x8x128xf32, #tpu.memory_space<vmem>>, vector<1x8x128xf32>
    tpu.vector_store %arg12[%c0_37, %c0_38, %c0_39], %96 {strides = array<i32>} : memref<1x8x128xf32, #tpu.memory_space<vmem>>, vector<1x8x128xf32>,
    return
  }
  func.func @transform_0(%arg0: i32, %arg1: memref<2xi32, #tpu.memory_space<smem>>) -> (i32, i32, i32) {
    %c0_i32 = arith.constant 0 : i32
    %c0_i32_0 = arith.constant 0 : i32
    %c0_i32_1 = arith.constant 0 : i32
    return %arg0, %c0_i32, %c0_i32_0 : i32, i32, i32
  }
  func.func @transform_1(%arg0: i32, %arg1: memref<2xi32, #tpu.memory_space<smem>>) -> (i32, i32, i32) {
    %c0_i32 = arith.constant 0 : i32
    %c0_i32_0 = arith.constant 0 : i32
    %c0_i32_1 = arith.constant 0 : i32
    return %arg0, %c0_i32, %c0_i32_0 : i32, i32, i32
  }
  func.func @transform_2(%arg0: i32, %arg1: memref<2xi32, #tpu.memory_space<smem>>) -> (i32, i32) {
    %c0_i32 = arith.constant 0 : i32
    %c0_i32_0 = arith.constant 0 : i32
    %c0_i32_1 = arith.constant 0 : i32
    return %c0_i32, %c0_i32_0 : i32, i32
  }
  func.func @transform_3(%arg0: i32, %arg1: memref<2xi32, #tpu.memory_space<smem>>) -> (i32, i32) {
    %c0_i32 = arith.constant 0 : i32
    %c0_i32_0 = arith.constant 0 : i32
    %c0_i32_1 = arith.constant 0 : i32
    return %c0_i32, %c0_i32_0 : i32, i32
  }
  func.func @transform_4(%arg0: i32, %arg1: memref<2xi32, #tpu.memory_space<smem>>) -> (i32, i32) {
    %c0_i32 = arith.constant 0 : i32
    %c0_i32_0 = arith.constant 0 : i32
    %c0_i32_1 = arith.constant 0 : i32
    return %c0_i32, %c0_i32_0 : i32, i32
  }
  func.func @transform_5(%arg0: i32, %arg1: memref<2xi32, #tpu.memory_space<smem>>) -> (i32, i32) {
    %c0_i32 = arith.constant 0 : i32
    %c0_i32_0 = arith.constant 0 : i32
    %c0_i32_1 = arith.constant 0 : i32
    return %c0_i32, %c0_i32_0 : i32, i32
  }
  func.func @transform_6(%arg0: i32, %arg1: memref<2xi32, #tpu.memory_space<smem>>) -> (i32, i32) {
    %c0_i32 = arith.constant 0 : i32
    %c0_i32_0 = arith.constant 0 : i32
    %c0_i32_1 = arith.constant 0 : i32
    return %c0_i32, %c0_i32_0 : i32, i32
  }
  func.func @transform_7(%arg0: i32, %arg1: memref<2xi32, #tpu.memory_space<smem>>) -> (i32, i32) {
    %c0_i32 = arith.constant 0 : i32
    %c0_i32_0 = arith.constant 0 : i32
    %c0_i32_1 = arith.constant 0 : i32
    return %c0_i32, %c0_i32_0 : i32, i32
  }
  func.func @transform_8(%arg0: i32, %arg1: memref<2xi32, #tpu.memory_space<smem>>) -> (i32, i32) {
    %c0_i32 = arith.constant 0 : i32
    %c0_i32_0 = arith.constant 0 : i32
    %c0_i32_1 = arith.constant 0 : i32
    return %c0_i32, %c0_i32_0 : i32, i32
  }
  func.func @transform_9(%arg0: i32, %arg1: memref<2xi32, #tpu.memory_space<smem>>) -> (i32, i32) {
    %c0_i32 = arith.constant 0 : i32
    %c0_i32_0 = arith.constant 0 : i32
    %c0_i32_1 = arith.constant 0 : i32
    return %c0_i32, %c0_i32_0 : i32, i32
  }
  func.func @transform_10(%arg0: i32, %arg1: memref<2xi32, #tpu.memory_space<smem>>) -> (i32, i32, i32) {
    %c0_i32 = arith.constant 0 : i32
    %c0_i32_0 = arith.constant 0 : i32
    %c0_i32_1 = arith.constant 0 : i32
    return %arg0, %c0_i32, %c0_i32_0 : i32, i32, i32
  }
}

</mosaic_0001>

<bundles_post_ra>
// kernel: pervasive_forward.1
= control target key start
LH: loop header
LB: loop body
LE: loop exit
PB: predicated region body
PF: predicated region fallthrough
CT: control target
= control target key end

     0   :  { %s3511_s0 = inlined_call_operand.vmem [shape: s32[2], index: 0, kind: input, shape index: {}]   ;;  %s3512_s1 = inlined_call_operand.vmem [shape: bf16[2,8,16], index: 1, kind: input, shape index: {}]   ;;  %s3513_s2 = inlined_call_operand.vmem [shape: bf16[2,8,16], index: 2, kind: input, shape index: {}]   ;;  %s3514_s3 = inlined_call_operand.vmem [shape: bf16[192,16], index: 3, kind: input, shape index: {}]   ;;  %s3515_s4 = inlined_call_operand.vmem [shape: f32[1,16], index: 4, kind: input, shape index: {}]   ;;  %s3516_s5 = inlined_call_operand.vmem [shape: bf16[288,16], index: 5, kind: input, shape index: {}]   ;;  %s3517_s6 = inlined_call_operand.vmem [shape: f32[1,16], index: 6, kind: input, shape index: {}]   ;;  %s3518_s7 = inlined_call_operand.vmem [shape: bf16[64,32], index: 7, kind: input, shape index: {}]   ;;  %s3519_s8 = inlined_call_operand.vmem [shape: f32[1,32], index: 8, kind: input, shape index: {}]   ;;  %s3520_s9 = inlined_call_operand.vmem [shape: bf16[32,128], index: 9, kind: input, shape index: {}]   ;;  %s3521_s10 = inlined_call_operand.vmem [shape: f32[1,128], index: 10, kind: input, shape index: {}]   ;;  %s3522_s11 = inlined_call_operand.hbm [shape: f32[2,8,128], index: 11, kind: output, shape index: {}]  }
   0x1   :  { %s16_s19 = sshll.u32 %s3511_s0, 4  ;;  %s17_s19 = int_to_ptr.vmem [resolvable:$true] %s16_s19 }
   0x2   :  { %s2535_s20 = scalar_lea.vmem %s17_s19, 16  ;;  %p2540_p1 = scmp.lt.s32.totalorder %s17_s19, %s17_s19 }
   0x3   :  { %p2536_p0 = scmp.ne.s32.totalorder %s17_s19, %s2535_s20  ;;  %p2541_p2 = scmp.lt.s32.totalorder %s2535_s20, %s2535_s20 }
   0x5   :  { %p2542_p3 = por %p2541_p2, %p2540_p1 }
   0x7   :  { %p2543_p4 = pnand %p2542_p3, %p2536_p0 }
   0x9   :  { %2546 = shalt.err (!%p2543_p4)  }
   0xa   :  { %s2613_s21 = smov [#allocation3]  }
   0xb   :  { %19 = dma.vmem_to_smem %s17_s19, 16, %s2613_s21, [#allocation2] }
   0xc   :  { %2591 = dma.done.wait [#allocation2], 16 }
   0xd   :  { %2592 = vsyncadd [#allocation2], 4294967280 }
   0xe   :  { %21 = sfence }
   0xf   :  { %22 = vsyncpa [#allocation5], 0 }
  0x10   :  { %24 = vsyncpa [#allocation5 + $0x1], 0  ;;  %s2689_s22 = smov 0   ;;  %s2691_s23 = smov 0  }
  0x11   :  { %s2693_s0 = smov 0   ;;  %s2695_s24 = smov 0  }
  0x12 LB: > { %s2710_s25 = sadd.s32 4294967295, %s2611_s24   ;;  %s2117_s26 = sadd.s32 4294967294, %s2611_s24   ;;  %s2611_s24 = sphi %s2695_s24, %s3534_s24   ;;  %s2607_s0 = sphi %s2693_s0, %s3533_s0   ;;  %s2603_s23 = sphi %s2691_s23, %s3532_s23   ;;  %s2599_s22 = sphi %s2689_s22, %s3531_s22  }
  0x13   : > { %s2714_s27 = sadd.s32 1, %s2611_s24   ;;  %s257_s28 = sadd.s32 1, %s2607_s0 }
  0x14   : > { %s254_s29 = ssub.s32 %s2611_s24, %s2714_s27  ;;  %p267_p5 = scmp.ne.s32.totalorder %s2607_s0, %s2603_s23 }
  0x15   : > { %p255_p6 = scmp.eq.s32.totalorder %s254_s29, 0  ;;  %p268_p7 = scmp.eq.s32.totalorder %s2710_s25, 1 }
  0x16   : > { %p273_p8 = scmp.ne.s32.totalorder %s2603_s23, %s2599_s22  ;;  %p274_p9 = scmp.eq.s32.totalorder %s2117_s26, 1 }
  0x17   : > { %s2725_s30 = scalar_select %p255_p6, %s2607_s0, %s257_s28  }
  0x18   : > { %p2727_p10 = por %p268_p7, %p267_p5  ;;  %p2731_p11 = por %p274_p9, %p273_p8 }
  0x19   : > { %p2120_p12 = scmp.ge.s32.totalorder %s2611_s24, 1  ;;  %p330_p13 = scmp.lt.s32.totalorder %s2611_s24, 3 }
  0x1b   : > { %p331_p0 = pnand %p2120_p12, %p330_p13 }
  0x1c   : > { %p371_p1 = scmp.lt.s32.totalorder (!%p331_p0), %s2710_s25, 1  ;;  %v389_v0 = vlaneseq (!%p331_p0)  ;;  %v2614_v1 = vmov (!%p331_p0), 1966171168   ;;  %s3525_s19 = smov (!%p331_p0), 16   ;;  %v2495_v30 = vld [vmem:[%s3514_s3] sm:$0xff] (!%p331_p0)   ;;  %v2616_v31 = vmov (!%p331_p0), 0  }
  0x1d   : > { %334 = sbr.rel (%p331_p0) target bundleno = 1952 (0x7a0), region = 60  ;;  %v387_v2 = vunpack.c.l.s4 (!%p331_p0), %v2614_v1  ;;  %873 = vmatprep.subr.bf16.mxu0 (!%p331_p0), %v2616_v31  ;;  %v2496_v32 = vld [vmem:[%s3514_s3 + $0x8] sm:$0xff] (!%p331_p0)   ;;  %v2497_v33 = vld [vmem:[%s3514_s3 + $0x10] sm:$0xff] (!%p331_p0)   ;;  %v2498_v34 = vld [vmem:[%s3514_s3 + $0x18] sm:$0xff] (!%p331_p0)   ;;  %vm490_vm0 = vcmask (!%p331_p0), 130048   ;;  %vm523_vm1 = vcmask (!%p331_p0), 1040384  }
  0x1e   : > { %v2741_v3 = vshrl.u32 (!%p331_p0), %v389_v0, 7  ;;  %874 = vmatpush1.bf16.msra.mxu0 (!%p331_p0), %v2495_v30  ;;  %v2499_v35 = vld [vmem:[%s3514_s3 + $0x20] sm:$0xff] (!%p331_p0)   ;;  %v2500_v36 = vld [vmem:[%s3514_s3 + $0x28] sm:$0xff] (!%p331_p0)   ;;  %v2501_v37 = vld [vmem:[%s3514_s3 + $0x30] sm:$0xff] (!%p331_p0)   ;;  %vm603_vm2 = vcmask (!%p331_p0), 1045504   ;;  %v2617_v53 = vmov (!%p331_p0), 0.0  }
  0x1f   : > { %v388_v4 = vunpack.c.0.s8 (!%p331_p0), %v387_v2  ;;  %875 = vmatprep.subr.bf16.mxu0 (!%p331_p0), %v2616_v31  ;;  %v2502_v38 = vld [vmem:[%s3514_s3 + $0x38] sm:$0xff] (!%p331_p0)   ;;  %v2503_v39 = vld [vmem:[%s3514_s3 + $0x40] sm:$0xff] (!%p331_p0)   ;;  %v2504_v40 = vld [vmem:[%s3514_s3 + $0x48] sm:$0xff] (!%p331_p0)   ;;  %v604_v54 = vrot.slane (!%p331_p0), %v2617_v53, 2  ;;  %vm555_vm3 = vcmask (!%p331_p0), 1046528   ;;  %v556_v62 = vrot.slane (!%p331_p0), %v2617_v53, 1 }
  0x20   : > { %v436_v9 = vsub.s32 (!%p331_p0), 0, %v2741_v3  ;;  %v2505_v47 = vld [vmem:[%s3514_s3 + $0x50] sm:$0xff] (!%p331_p0)   ;;  %v2506_v55 = vld [vmem:[%s3514_s3 + $0x58] sm:$0xff] (!%p331_p0)   ;;  %s3523_s21 = smov (!%p331_p0), 64   ;;  %s2619_s26 = smov (!%p331_p0), 32   ;;  %vm715_vm4 = vcmask (!%p331_p0), 261120  }
  0x21   : > { %v391_v5 = vsub.s32 (!%p331_p0), %v388_v4, %v2741_v3  ;;  %s2620_s28 = smov (!%p331_p0), 96   ;;  %vm724_vm5 = vcmask (!%p331_p0), 523264   ;;  %vm733_vm6 = vcmask (!%p331_p0), 785408   ;;  %s3529_s20 = smov (!%p331_p0), 16   ;;  %vm1259_vm7 = vcmask (!%p331_p0), 392192  }
  0x22   : > { %876 = vmatpush1.bf16.msra.mxu0 (!%p331_p0), %v2496_v32  ;;  %s2622_s16 = smov (!%p331_p0), 112   ;;  %vm1292_vm8 = vcmask (!%p331_p0), 916480   ;;  %vm2623_vm9 = vmmov (!%p331_p0), 0   ;;  %vm1761_vm11 = vcmask (!%p331_p0), 516096   ;;  %vm1759_vm12 = vcmask (!%p331_p0), 523265  }
  0x23   : > { %877 = vmatprep.subr.bf16.mxu0 (!%p331_p0), %v2616_v31  ;;  %vm1872_vm13 = vcmask (!%p331_p0), 1041409   ;;  %vm1874_vm14 = vcmask (!%p331_p0), 1042434   ;;  %vm1876_vm15 = vcmask (!%p331_p0), 1043459  }
  0x24   : > { %s2739_s14 = scalar_select %p371_p1, %s2710_s25, 1 }
  0x26   : > { %s2122_s15 = sshll.u32 %s2739_s14, 2  ;;  %878 = vmatpush1.bf16.msra.mxu0 %v2497_v33  ;;  %s3530_s14 = smov 64  }
  0x27   : > { %s378_s18 = scalar_lea.vmem %s3513_s2, %s2122_s15  ;;  %879 = vmatprep.subr.bf16.mxu0 %v2616_v31  ;;  %s374_s17 = scalar_lea.vmem %s3512_s1, %s2122_s15 }
  0x28   : > { %v382_v6 = vld [vmem:[%s378_s18] sm:$0xf]  ;;  %s2621_s15 = smov 48  }
  0x29   : > { %v383_v7 = vunpack.c.l.bf16 %v382_v6  ;;  %v380_v41 = vld [vmem:[%s374_s17] sm:$0xf] }
  0x2a   : > { %880 = vmatpush1.bf16.msra.mxu0 %v2498_v34  ;;  %v2794_v42 = vunpack.c.l.bf16 %v380_v41 }
  0x2b   : > { %v392_v8 = vrot.slane %v383_v7, %v391_v5  ;;  %v385_v10 = vcombine.high %v383_v7, %v383_v7  ;;  %881 = vmatprep.subr.bf16.mxu0 %v2616_v31 }
  0x2d   : > { %v408_v11 = vrot.slane %v392_v8, %v391_v5  ;;  %v400_v12 = vcombine.high %v392_v8, %v392_v8  ;;  %v399_v13 = vrot.slane %v385_v10, %v391_v5 }
  0x2e   : > { %882 = vmatpush1.bf16.msra.mxu0 %v2499_v35 }
  0x2f   : > { %v437_v14 = vrot.slane %v408_v11, %v436_v9  ;;  %v430_v15 = vcombine.high %v408_v11, %v408_v11  ;;  %v422_v16 = vrot.slane %v400_v12, %v391_v5  ;;  %v401_v17 = vcombine.high %v399_v13, %v399_v13  ;;  %883 = vmatprep.subr.bf16.mxu0 %v2616_v31 }
  0x30   : > { %v415_v21 = vrot.slane %v399_v13, %v391_v5 }
  0x31   : > { %466 = vrot.lane.b32.xlu0 %v437_v14, %s3525_s19  ;;  %v445_v18 = vrot.slane %v430_v15, %v436_v9  ;;  %v441_v19 = vrot.slane %v422_v16, %v436_v9  ;;  %v432_v20 = vcombine.high %v422_v16, %v422_v16  ;;  %v429_v23 = vrot.slane %v401_v17, %v391_v5 }
  0x32   : > { %v453_v24 = vrot.slane %v415_v21, %v436_v9  ;;  %v431_v25 = vcombine.high %v415_v21, %v415_v21  ;;  %884 = vmatpush1.bf16.msra.mxu0 %v2500_v36 }
  0x33   : > { %470 = vrot.lane.b32.xlu1 %v445_v18, %s3525_s19  ;;  %v449_v22 = vrot.slane %v432_v20, %v436_v9  ;;  %v457_v26 = vrot.slane %v429_v23, %v436_v9  ;;  %v433_v27 = vcombine.high %v429_v23, %v429_v23  ;;  %885 = vmatprep.subr.bf16.mxu0 %v2616_v31 }
  0x34   : > { %v461_v28 = vrot.slane %v431_v25, %v436_v9 }
  0x35   : > { %468 = vrot.lane.b32.xlu0 %v441_v19, %s3525_s19  ;;  %v465_v29 = vrot.slane %v433_v27, %v436_v9 }
  0x36   : > { %886 = vmatpush1.bf16.msra.mxu0 %v2501_v37 }
  0x37   : > { %472 = vrot.lane.b32.xlu1 %v449_v22, %s3525_s19  ;;  %887 = vmatprep.subr.bf16.mxu0 %v2616_v31 }
  0x39   : > { %474 = vrot.lane.b32.xlu0 %v453_v24, %s3525_s19 }
  0x3a   : > { %888 = vmatpush1.bf16.msra.mxu0 %v2502_v38 }
  0x3b   : > { %476 = vrot.lane.b32.xlu1 %v457_v26, %s3525_s19  ;;  %889 = vmatprep.subr.bf16.mxu0 %v2616_v31 }
  0x3d   : > { %478 = vrot.lane.b32.xlu0 %v461_v28, %s3525_s19 }
  0x3e   : > { %890 = vmatpush1.bf16.msra.mxu0 %v2503_v39 }
  0x3f   : > { %480 = vrot.lane.b32.xlu1 %v465_v29, %s3525_s19  ;;  %891 = vmatprep.subr.bf16.mxu0 %v2616_v31 }
  0x42   : > { %892 = vmatpush1.bf16.msra.mxu0 %v2504_v40 }
  0x43   : > { %893 = vmatprep.subr.bf16.mxu0 %v2616_v31 }
  0x46   : > { %894 = vmatpush1.bf16.msra.mxu0 %v2505_v47 }
  0x47   : > { %895 = vmatprep.subr.bf16.mxu0 %v2616_v31 }
  0x4a   : > { %896 = vmatpush1.bf16.msra.mxu0 %v2506_v55 }
  0x4b   : > { %2244 = vmatprep.subr.bf16.mxu0 %v2617_v53 }
  0xa3   : > { %v467_v43 = vpop.permute.xlu0 %466 }
  0xa4   : > { %v491_v44 = vsel %vm490_vm0, %v2794_v42, %v467_v43 }
  0xa5   : > { %v507_v45 = vrot.slane %v491_v44, 7  ;;  %v471_v46 = vpop.permute.xlu1 %470 }
  0xa6   : > { %v493_v48 = vsel %vm490_vm0, %v2794_v42, %v471_v46 }
  0xa7   : > { %v2804_v49 = vsel %vm523_vm1, 0.0, %v507_v45  ;;  %v2807_v50 = vsel %vm523_vm1, %v507_v45, 0.0  ;;  %v509_v51 = vrot.slane %v493_v48, 7  ;;  %v469_v52 = vpop.permute.xlu0 %468 }
  0xa8   : > { %v559_v56 = vrot.slane %v2807_v50, 1  ;;  %v607_v57 = vrot.slane %v2807_v50, 2  ;;  %v492_v58 = vsel %vm490_vm0, %v2794_v42, %v469_v52  ;;  %v606_v59 = vrot.slane %v2804_v49, 2 }
  0xa9   : > { %v508_v60 = vrot.slane %v492_v58, 7  ;;  %v473_v61 = vpop.permute.xlu1 %472  ;;  %v558_v63 = vrot.slane %v2804_v49, 1  ;;  %v2821_v0 = vsel %vm523_vm1, %v509_v51, 0.0  ;;  %v2833_v9 = vsel %vm523_vm1, 0.0, %v509_v51 }
  0xaa   : > { %v494_v1 = vsel %vm490_vm0, %v2794_v42, %v473_v61  ;;  %v608_v2 = vsel %vm603_vm2, %v606_v59, %v607_v57  ;;  %v613_v13 = vrot.slane %v2821_v0, 2  ;;  %v565_v16 = vrot.slane %v2821_v0, 1 }
  0xab   : > { %v2827_v4 = vsel %vm523_vm1, 0.0, %v508_v60  ;;  %v2830_v5 = vsel %vm523_vm1, %v508_v60, 0.0  ;;  %v510_v6 = vrot.slane %v494_v1, 7  ;;  %v2320_v7 = vpack.i.bf16 %v608_v2, %v604_v54  ;;  %v475_v8 = vpop.permute.xlu0 %474 }
  0xac   : > { %v610_v10 = vrot.slane %v2830_v5, 2  ;;  %v2837_v11 = vsel %vm555_vm3, %v558_v63, %v559_v56  ;;  %v495_v12 = vsel %vm490_vm0, %v2794_v42, %v475_v8  ;;  %v562_v17 = vrot.slane %v2830_v5, 1 }
  0xad   : > { %2321 = vrot.lane.b32.xlu1 %v2320_v7, %s3523_s21  ;;  %v2315_v14 = vpack.i.bf16 %v2837_v11, %v556_v62  ;;  %v511_v15 = vrot.slane %v495_v12, 7  ;;  %v609_v18 = vrot.slane %v2827_v4, 2  ;;  %v477_v19 = vpop.permute.xlu1 %476  ;;  %v2849_v20 = vsel %vm523_vm1, %v510_v6, 0.0 }
  0xae   : > { %v2325_v21 = vpack.i.bf16 %v2827_v4, %v2804_v49  ;;  %v612_v22 = vrot.slane %v2833_v9, 2  ;;  %v561_v23 = vrot.slane %v2827_v4, 1  ;;  %v2857_v24 = vsel %vm523_vm1, 0.0, %v510_v6 }
  0xaf   : > { %2316 = vrot.lane.b32.xlu0 %v2315_v14, %s2619_s26  ;;  %v2860_v25 = vsel %vm523_vm1, 0.0, %v511_v15  ;;  %v611_v26 = vsel %vm603_vm2, %v609_v18, %v610_v10  ;;  %v564_v27 = vrot.slane %v2833_v9, 1  ;;  %v479_v28 = vpop.permute.xlu0 %478  ;;  %v2865_v29 = vsel %vm523_vm1, %v511_v15, 0.0 }
  0xb0   : > { %v2330_v30 = vpack.i.bf16 %v611_v26, %v608_v2  ;;  %v614_v31 = vsel %vm603_vm2, %v612_v22, %v613_v13  ;;  %v496_v32 = vsel %vm490_vm0, %v2794_v42, %v477_v19  ;;  %v616_v33 = vrot.slane %v2849_v20, 2 }
  0xb1   : > { %2326 = vrot.lane.b32.xlu1 %v2325_v21, %s2620_s28  ;;  %v2873_v34 = vsel %vm555_vm3, %v561_v23, %v562_v17  ;;  %v2876_v35 = vsel %vm555_vm3, %v564_v27, %v565_v16  ;;  %v512_v36 = vrot.slane %v496_v32, 7  ;;  %v2340_v37 = vpack.i.bf16 %v614_v31, %v611_v26  ;;  %v481_v47 = vpop.permute.xlu1 %480 }
  0xb2   : > { %v615_v38 = vrot.slane %v2857_v24, 2  ;;  %v497_v39 = vsel %vm490_vm0, %v2794_v42, %v479_v28  ;;  %v619_v40 = vrot.slane %v2865_v29, 2  ;;  %v618_v43 = vrot.slane %v2860_v25, 2 }
  0xb3   : > { %2331 = vrot.lane.b32.xlu0 %v2330_v30, %s2619_s26  ;;  %v513_v41 = vrot.slane %v497_v39, 7  ;;  %v2335_v44 = vpack.i.bf16 %v2876_v35, %v2873_v34  ;;  %v2888_v45 = vsel %vm523_vm1, 0.0, %v512_v36  ;;  %v2891_v46 = vsel %vm523_vm1, %v512_v36, 0.0 }
  0xb4   : > { %v568_v48 = vrot.slane %v2849_v20, 1  ;;  %v571_v51 = vrot.slane %v2865_v29, 1  ;;  %v617_v52 = vsel %vm603_vm2, %v615_v38, %v616_v33  ;;  %v567_v54 = vrot.slane %v2857_v24, 1 }
  0xb5   : > { %2341 = vrot.lane.b32.xlu1 %v2340_v37, %s3523_s21  ;;  %v2345_v55 = vpack.i.bf16 %v2857_v24, %v2833_v9  ;;  %v2901_v56 = vsel %vm523_vm1, 0.0, %v513_v41  ;;  %v2904_v57 = vsel %vm523_vm1, %v513_v41, 0.0  ;;  %v570_v58 = vrot.slane %v2860_v25, 1 }
  0xb6   : > { %v622_v59 = vrot.slane %v2891_v46, 2  ;;  %v620_v60 = vsel %vm603_vm2, %v618_v43, %v619_v40  ;;  %v498_v61 = vsel %vm490_vm0, %v2794_v42, %v481_v47  ;;  %v621_v62 = vrot.slane %v2888_v45, 2 }
  0xb7   : > { %2336 = vrot.lane.b32.xlu0 %v2335_v44, %s2619_s26  ;;  %v2350_v63 = vpack.i.bf16 %v617_v52, %v614_v31  ;;  %v514_v1 = vrot.slane %v498_v61, 7  ;;  %v625_v2 = vrot.slane %v2904_v57, 2  ;;  %v2915_v6 = vsel %vm555_vm3, %v567_v54, %v568_v48 }
  0xb8   : > { %v2918_v7 = vsel %vm555_vm3, %v570_v58, %v571_v51  ;;  %v624_v8 = vrot.slane %v2901_v56, 2  ;;  %v574_v10 = vrot.slane %v2891_v46, 1  ;;  %v2360_v42 = vpack.i.bf16 %v620_v60, %v617_v52 }
  0xb9   : > { %2346 = vrot.lane.b32.xlu1 %v2345_v55, %s2620_s28  ;;  %v577_v12 = vrot.slane %v2904_v57, 1  ;;  %v623_v13 = vsel %vm603_vm2, %v621_v62, %v622_v59  ;;  %v573_v14 = vrot.slane %v2888_v45, 1  ;;  %v576_v15 = vrot.slane %v2901_v56, 1 }
  0xba   : > { %v2355_v16 = vpack.i.bf16 %v2918_v7, %v2915_v6  ;;  %v2931_v17 = vsel %vm523_vm1, 0.0, %v514_v1  ;;  %v2934_v18 = vsel %vm523_vm1, %v514_v1, 0.0  ;;  %v626_v19 = vsel %vm603_vm2, %v624_v8, %v625_v2 }
  0xbb   : > { %2351 = vrot.lane.b32.xlu0 %v2350_v63, %s2619_s26  ;;  %v2365_v21 = vpack.i.bf16 %v2888_v45, %v2860_v25  ;;  %v2370_v22 = vpack.i.bf16 %v623_v13, %v620_v60  ;;  %v688_v23 = vrot.slane %v2931_v17, 2  ;;  %v689_v26 = vrot.slane %v2934_v18, 2 }
  0xbc   : > { %v2943_v27 = vsel %vm555_vm3, %v573_v14, %v574_v10  ;;  %v2946_v28 = vsel %vm555_vm3, %v576_v15, %v577_v12  ;;  %v2380_v30 = vpack.i.bf16 %v626_v19, %v623_v13  ;;  %v2390_v33 = vpack.i.bf16 %v2931_v17, %v2901_v56 }
  0xbd   : > { %2361 = vrot.lane.b32.xlu1 %v2360_v42, %s3523_s21  ;;  %v2375_v31 = vpack.i.bf16 %v2946_v28, %v2943_v27  ;;  %v690_v32 = vsel %vm603_vm2, %v688_v23, %v689_v26 }
  0xbe   : > { %v2385_v36 = vpack.i.bf16 %v690_v32, %v626_v19 }
  0xbf   : > { %2356 = vrot.lane.b32.xlu0 %v2355_v16, %s2619_s26 }
  0xc1   : > { %2366 = vrot.lane.b32.xlu1 %v2365_v21, %s2620_s28 }
  0xc3   : > { %2371 = vrot.lane.b32.xlu0 %v2370_v22, %s2619_s26 }
  0xc5   : > { %2381 = vrot.lane.b32.xlu1 %v2380_v30, %s3523_s21 }
  0xc7   : > { %2376 = vrot.lane.b32.xlu0 %v2375_v31, %s2619_s26 }
  0xc9   : > { %2391 = vrot.lane.b32.xlu1 %v2390_v33, %s2620_s28 }
  0xcb   : > { %2386 = vrot.lane.b32.xlu0 %v2385_v36, %s2619_s26 }
  0xcf   : > { %1002 = vrot.lane.b32.xlu0 %v2617_v53, %s2619_s26 }
 0x11f   : > { %v2322_v37 = vpop.permute.xlu1 %2321 }
 0x120   : > { %v2324_v38 = vunpack.i.h.bf16 %v2322_v37  ;;  %v2323_v39 = vunpack.i.l.bf16 %v2322_v37 }
 0x121   : > { %v2317_v40 = vpop.permute.xlu0 %2316 }
 0x122   : > { %v2319_v41 = vunpack.i.h.bf16 %v2317_v40  ;;  %v2318_v43 = vunpack.i.l.bf16 %v2317_v40 }
 0x123   : > { %v2327_v44 = vpop.permute.xlu1 %2326 }
 0x124   : > { %v717_v47 = vsel %vm715_vm4, %v2804_v49, %v2319_v41  ;;  %v716_v48 = vsel %vm715_vm4, 0.0, %v2318_v43  ;;  %v2329_v51 = vunpack.i.h.bf16 %v2327_v44  ;;  %v2328_v52 = vunpack.i.l.bf16 %v2327_v44 }
 0x125   : > { %v725_v54 = vsel %vm724_vm5, %v716_v48, %v2323_v39  ;;  %v2332_v55 = vpop.permute.xlu0 %2331  ;;  %v726_v58 = vsel %vm724_vm5, %v717_v47, %v2324_v38 }
 0x126   : > { %v2334_v59 = vunpack.i.h.bf16 %v2332_v55  ;;  %v2333_v60 = vunpack.i.l.bf16 %v2332_v55  ;;  %v734_v61 = vsel %vm733_vm6, %v725_v54, %v2328_v52  ;;  %v735_v62 = vsel %vm733_vm6, %v726_v58, %v2329_v51 }
 0x127   : > { %v2342_v63 = vpop.permute.xlu1 %2341  ;;  %v750_v8 = vpack.c.bf16 %v735_v62, %v734_v61 }
 0x128   : > { %v742_v1 = vsel %vm715_vm4, %v2837_v11, %v2333_v60  ;;  %v743_v2 = vsel %vm715_vm4, %v2873_v34, %v2334_v59  ;;  %v2344_v10 = vunpack.i.h.bf16 %v2342_v63  ;;  %v2343_v42 = vunpack.i.l.bf16 %v2342_v63 }
 0x129   : > { %v2337_v12 = vpop.permute.xlu0 %2336  ;;  %v751_v13 = vpack.c.bf16 %v743_v2, %v742_v1 }
 0x12a   : > { %v2339_v14 = vunpack.i.h.bf16 %v2337_v12  ;;  %v2338_v15 = vunpack.i.l.bf16 %v2337_v12 }
 0x12b   : > { %2137 = vmatprep.mubr.msk.bf16.mxu0 %vm724_vm5, %v751_v13  ;;  %v2347_v16 = vpop.permute.xlu1 %2346 }
 0x12c   : > { %v719_v19 = vsel %vm715_vm4, %v2833_v9, %v2339_v14  ;;  %v718_v21 = vsel %vm715_vm4, %v2827_v4, %v2338_v15  ;;  %906 = vmatmul.mubr.bf16.vlgmr.msra.gmra.mrb[0].mxu0 %v750_v8  ;;  %v2349_v11 = vunpack.i.h.bf16 %v2347_v16  ;;  %v2348_v22 = vunpack.i.l.bf16 %v2347_v16 }
 0x12d   : > { %v2352_v34 = vpop.permute.xlu0 %2351  ;;  %v727_v23 = vsel %vm724_vm5, %v718_v21, %v2343_v42  ;;  %v728_v26 = vsel %vm724_vm5, %v719_v19, %v2344_v10  ;;  %v677_v19 = vrot.slane %v2931_v17, 1  ;;  %v678_v21 = vrot.slane %v2934_v18, 1 }
 0x12e   : > { %v2354_v30 = vunpack.i.h.bf16 %v2352_v34  ;;  %v2353_v31 = vunpack.i.l.bf16 %v2352_v34  ;;  %v736_v32 = vsel %vm733_vm6, %v727_v23, %v2348_v22  ;;  %v737_v33 = vsel %vm733_vm6, %v728_v26, %v2349_v11 }
 0x12f   : > { %v2362_v36 = vpop.permute.xlu1 %2361  ;;  %v752_v39 = vpack.c.bf16 %v737_v33, %v736_v32 }
 0x130   : > { %v745_v37 = vsel %vm715_vm4, %v2915_v6, %v2354_v30  ;;  %v744_v38 = vsel %vm715_vm4, %v2876_v35, %v2353_v31  ;;  %v2364_v41 = vunpack.i.h.bf16 %v2362_v36  ;;  %v2363_v43 = vunpack.i.l.bf16 %v2362_v36 }
 0x131   : > { %v753_v40 = vpack.c.bf16 %v745_v37, %v744_v38  ;;  %v2357_v44 = vpop.permute.xlu0 %2356  ;;  %v679_v37 = vsel %vm555_vm3, %v677_v19, %v678_v21 }
 0x132   : > { %v2359_v47 = vunpack.i.h.bf16 %v2357_v44  ;;  %v2358_v48 = vunpack.i.l.bf16 %v2357_v44 }
 0x133   : > { %2138 = vmatprep.mubr.msk.bf16.mxu0 %vm724_vm5, %v753_v40  ;;  %v2367_v51 = vpop.permute.xlu1 %2366 }
 0x134   : > { %v721_v52 = vsel %vm715_vm4, %v2860_v25, %v2359_v47  ;;  %v720_v54 = vsel %vm715_vm4, %v2857_v24, %v2358_v48  ;;  %914 = vmatmul.mubr.bf16.gmra.mrb[4].mxu0 %v752_v39  ;;  %v2369_v6 = vunpack.i.h.bf16 %v2367_v51  ;;  %v2368_v55 = vunpack.i.l.bf16 %v2367_v51 }
 0x135   : > { %v2372_v35 = vpop.permute.xlu0 %2371  ;;  %v729_v58 = vsel %vm724_vm5, %v720_v54, %v2363_v43  ;;  %v730_v59 = vsel %vm724_vm5, %v721_v52, %v2364_v41  ;;  %v2124_v43 = vld [vmem:[%s3515_s4] ss:$0 sm:$0xff] }
 0x136   : > { %v2374_v60 = vunpack.i.h.bf16 %v2372_v35  ;;  %v2373_v61 = vunpack.i.l.bf16 %v2372_v35  ;;  %v738_v62 = vsel %vm733_vm6, %v729_v58, %v2368_v55  ;;  %v739_v63 = vsel %vm733_vm6, %v730_v59, %v2369_v6 }
 0x137   : > { %v2382_v1 = vpop.permute.xlu1 %2381  ;;  %v754_v10 = vpack.c.bf16 %v739_v63, %v738_v62 }
 0x138   : > { %v747_v2 = vsel %vm715_vm4, %v2943_v27, %v2374_v60  ;;  %v746_v8 = vsel %vm715_vm4, %v2918_v7, %v2373_v61  ;;  %v2384_v12 = vunpack.i.h.bf16 %v2382_v1  ;;  %v2383_v13 = vunpack.i.l.bf16 %v2382_v1 }
 0x139   : > { %v755_v42 = vpack.c.bf16 %v747_v2, %v746_v8  ;;  %v2377_v14 = vpop.permute.xlu0 %2376 }
 0x13a   : > { %v2379_v15 = vunpack.i.h.bf16 %v2377_v14  ;;  %v2378_v16 = vunpack.i.l.bf16 %v2377_v14 }
 0x13b   : > { %2139 = vmatprep.mubr.msk.bf16.mxu0 %vm724_vm5, %v755_v42  ;;  %v2392_v11 = vpop.permute.xlu1 %2391 }
 0x13c   : > { %v723_v27 = vsel %vm715_vm4, %v2901_v56, %v2379_v15  ;;  %v722_v7 = vsel %vm715_vm4, %v2888_v45, %v2378_v16  ;;  %922 = vmatmul.mubr.bf16.gmra.mrb[8].mxu0 %v754_v10  ;;  %v2394_v22 = vunpack.i.h.bf16 %v2392_v11  ;;  %v2393_v34 = vunpack.i.l.bf16 %v2392_v11 }
 0x13d   : > { %v2387_v23 = vpop.permute.xlu0 %2386  ;;  %v731_v26 = vsel %vm724_vm5, %v722_v7, %v2383_v13  ;;  %v732_v30 = vsel %vm724_vm5, %v723_v27, %v2384_v12 }
 0x13e   : > { %v2389_v31 = vunpack.i.h.bf16 %v2387_v23  ;;  %v2388_v32 = vunpack.i.l.bf16 %v2387_v23  ;;  %v740_v33 = vsel %vm733_vm6, %v731_v26, %v2393_v34  ;;  %v741_v36 = vsel %vm733_vm6, %v732_v30, %v2394_v22 }
 0x13f   : > { %v756_v40 = vpack.c.bf16 %v741_v36, %v740_v33 }
 0x140   : > { %v749_v38 = vsel %vm715_vm4, %v679_v37, %v2389_v31  ;;  %v748_v39 = vsel %vm715_vm4, %v2946_v28, %v2388_v32 }
 0x141   : > { %v757_v41 = vpack.c.bf16 %v749_v38, %v748_v39 }
 0x143   : > { %2140 = vmatprep.mubr.msk.bf16.mxu0 %vm724_vm5, %v757_v41 }
 0x144   : > { %930 = vmatmul.mubr.bf16.gmra.mrb[12].mxu0 %v756_v40 }
 0x145   : > { %2252 = vmatprep.mubr.msk.bf16.mxu0 %vm2623_vm9, %v2617_v53 }
 0x1ff   : > { %v907_v44 = vpop.f32.mrb[0].mxu0 }
 0x200   : > { %v908_v47 = vadd.f32 %v2124_v43, %v907_v44  ;;  %v909_v48 = vpop.f32.mrb[1].mxu0 }
 0x201   : > { %v910_v51 = vpop.f32.mrb[2].mxu0 }
 0x202   : > { %v938_v52 = vmax.f32 %v908_v47, 0.0  ;;  %v911_v54 = vadd.f32 %v2124_v43, %v910_v51  ;;  %v912_v6 = vpop.f32.mrb[3].mxu0 }
 0x204   : > { %v954_v55 = vrot.slane %v938_v52, 7  ;;  %v939_v35 = vmax.f32 %v911_v54, 0.0 }
 0x206   : > { %v955_v58 = vrot.slane %v939_v35, 7  ;;  %v978_v28 = vsel %vm523_vm1, %v954_v55, 0.0  ;;  %v970_v59 = vsel %vm523_vm1, 0.0, %v954_v55 }
 0x207   : > { %v915_v60 = vpop.f32.mrb[4].mxu0  ;;  %1006 = vrot.lane.b32.xlu1 %v978_v28, %s2619_s26  ;;  %1004 = vrot.lane.b32.xlu0 %v970_v59, %s2619_s26  ;;  %v2507_v28 = vld [vmem:[%s3516_s5 + $0x40] sm:$0xff]  }
 0x208   : > { %v916_v61 = vadd.f32 %v2124_v43, %v915_v60  ;;  %v917_v62 = vpop.f32.mrb[5].mxu0  ;;  %v971_v10 = vsel %vm523_vm1, 0.0, %v955_v58  ;;  %v979_v42 = vsel %vm523_vm1, %v955_v58, 0.0  ;;  %v2508_v59 = vld [vmem:[%s3516_s5] sm:$0xff]   ;;  %v2509_v60 = vld [vmem:[%s3516_s5 + $0x48] sm:$0xff]   ;;  %2178 = vmatprep.subr.bf16.mxu1 %v2507_v28 }
 0x209   : > { %v918_v63 = vpop.f32.mrb[6].mxu0  ;;  %2179 = vmatpush3.bf16.msra.mxu1 %v2508_v59  ;;  %v2511_v62 = vld [vmem:[%s3516_s5 + $0x50] sm:$0xff]  }
 0x20a   : > { %v940_v1 = vmax.f32 %v916_v61, 0.0  ;;  %v919_v2 = vadd.f32 %v2124_v43, %v918_v63  ;;  %v920_v8 = vpop.f32.mrb[7].mxu0  ;;  %v2510_v61 = vld [vmem:[%s3516_s5 + $0x8] sm:$0xff]   ;;  %2180 = vmatprep.subr.bf16.mxu1 %v2509_v60  ;;  %v2512_v63 = vld [vmem:[%s3516_s5 + $0x10] sm:$0xff]  }
 0x20b   : > { %1008 = vrot.lane.b32.xlu1 %v971_v10, %s2619_s26  ;;  %1010 = vrot.lane.b32.xlu0 %v979_v42, %s2619_s26  ;;  %v2515_v8 = vld [vmem:[%s3516_s5 + $0x60] sm:$0xff]   ;;  %v1003_v42 = vpop.permute.xlu0 %1002 }
 0x20c   : > { %v956_v12 = vrot.slane %v940_v1, 7  ;;  %v941_v13 = vmax.f32 %v919_v2, 0.0  ;;  %v2513_v1 = vld [vmem:[%s3516_s5 + $0x58] sm:$0xff]   ;;  %v2516_v10 = vld [vmem:[%s3516_s5 + $0x20] sm:$0xff]  }
 0x20d   : > { %2181 = vmatpush3.bf16.msra.mxu1 %v2510_v61  ;;  %v2514_v2 = vld [vmem:[%s3516_s5 + $0x18] sm:$0xff]  }
 0x20e   : > { %v957_v14 = vrot.slane %v941_v13, 7  ;;  %v972_v15 = vsel %vm523_vm1, 0.0, %v956_v12  ;;  %v980_v16 = vsel %vm523_vm1, %v956_v12, 0.0  ;;  %2182 = vmatprep.subr.bf16.mxu1 %v2511_v62  ;;  %v2517_v12 = vld [vmem:[%s3516_s5 + $0x68] sm:$0xff]  }
 0x20f   : > { %v923_v19 = vpop.f32.mrb[8].mxu0  ;;  %1012 = vrot.lane.b32.xlu1 %v972_v15, %s2619_s26  ;;  %1014 = vrot.lane.b32.xlu0 %v980_v16, %s2619_s26  ;;  %v2518_v13 = vld [vmem:[%s3516_s5 + $0x28] sm:$0xff]  }
 0x210   : > { %v924_v21 = vadd.f32 %v2124_v43, %v923_v19  ;;  %v925_v11 = vpop.f32.mrb[9].mxu0  ;;  %v973_v23 = vsel %vm523_vm1, 0.0, %v957_v14  ;;  %v981_v26 = vsel %vm523_vm1, %v957_v14, 0.0  ;;  %v3086_v14 = vsel %vm715_vm4, 0.0, %v1003_v42  ;;  %v2519_v19 = vld [vmem:[%s3516_s5 + $0x70] sm:$0xff]  }
 0x211   : > { %v926_v27 = vpop.f32.mrb[10].mxu0  ;;  %2183 = vmatpush3.bf16.msra.mxu1 %v2512_v63 }
 0x212   : > { %v942_v7 = vmax.f32 %v924_v21, 0.0  ;;  %v927_v22 = vadd.f32 %v2124_v43, %v926_v27  ;;  %v928_v34 = vpop.f32.mrb[11].mxu0  ;;  %2184 = vmatprep.subr.bf16.mxu1 %v2513_v1  ;;  %v2520_v27 = vld [vmem:[%s3516_s5 + $0x30] sm:$0xff]  }
 0x213   : > { %1016 = vrot.lane.b32.xlu1 %v973_v23, %s2619_s26  ;;  %1018 = vrot.lane.b32.xlu0 %v981_v26, %s2619_s26  ;;  %v1132_v34 = vrot.slane %v3086_v14, 2 }
 0x214   : > { %v958_v30 = vrot.slane %v942_v7, 7  ;;  %v943_v31 = vmax.f32 %v927_v22, 0.0 }
 0x215   : > { %2185 = vmatpush3.bf16.msra.mxu1 %v2514_v2 }
 0x216   : > { %v959_v32 = vrot.slane %v943_v31, 7  ;;  %v974_v33 = vsel %vm523_vm1, 0.0, %v958_v30  ;;  %v982_v36 = vsel %vm523_vm1, %v958_v30, 0.0  ;;  %2186 = vmatprep.subr.bf16.mxu1 %v2515_v8  ;;  %v2521_v31 = vld [vmem:[%s3516_s5 + $0x78] sm:$0xff]  }
 0x217   : > { %v931_v37 = vpop.f32.mrb[12].mxu0  ;;  %1020 = vrot.lane.b32.xlu1 %v974_v33, %s2619_s26  ;;  %1022 = vrot.lane.b32.xlu0 %v982_v36, %s2619_s26 }
 0x218   : > { %v932_v38 = vadd.f32 %v2124_v43, %v931_v37  ;;  %v933_v39 = vpop.f32.mrb[13].mxu0  ;;  %v975_v48 = vsel %vm523_vm1, 0.0, %v959_v32  ;;  %v983_v51 = vsel %vm523_vm1, %v959_v32, 0.0  ;;  %v2522_v32 = vld [vmem:[%s3516_s5 + $0x38] sm:$0xff]  }
 0x219   : > { %v934_v40 = vpop.f32.mrb[14].mxu0  ;;  %2187 = vmatpush3.bf16.msra.mxu1 %v2516_v10  ;;  %v3162_v10 = vld [vmem:[%s3516_s5 + $0x80] sm:$0xff]  }
 0x21a   : > { %v944_v41 = vmax.f32 %v932_v38, 0.0  ;;  %v935_v44 = vadd.f32 %v2124_v43, %v934_v40  ;;  %v936_v47 = vpop.f32.mrb[15].mxu0  ;;  %2188 = vmatprep.subr.bf16.mxu1 %v2517_v12 }
 0x21b   : > { %1024 = vrot.lane.b32.xlu1 %v975_v48, %s2619_s26  ;;  %1026 = vrot.lane.b32.xlu0 %v983_v51, %s2619_s26  ;;  %v1085_v51 = vrot.slane %v3086_v14, 1 }
 0x21c   : > { %v960_v52 = vrot.slane %v944_v41, 7  ;;  %v945_v54 = vmax.f32 %v935_v44, 0.0 }
 0x21d   : > { %2189 = vmatpush3.bf16.msra.mxu1 %v2518_v13 }
 0x21e   : > { %v961_v6 = vrot.slane %v945_v54, 7  ;;  %v976_v55 = vsel %vm523_vm1, 0.0, %v960_v52  ;;  %v984_v35 = vsel %vm523_vm1, %v960_v52, 0.0  ;;  %2190 = vmatprep.subr.bf16.mxu1 %v2519_v19 }
 0x21f   : > { %1028 = vrot.lane.b32.xlu1 %v976_v55, %s2619_s26  ;;  %1030 = vrot.lane.b32.xlu0 %v984_v35, %s2619_s26 }
 0x220   : > { %v977_v43 = vsel %vm523_vm1, 0.0, %v961_v6  ;;  %v985_v58 = vsel %vm523_vm1, %v961_v6, 0.0 }
 0x221   : > { %2191 = vmatpush3.bf16.msra.mxu1 %v2520_v27 }
 0x222   : > { %2192 = vmatprep.subr.bf16.mxu1 %v2521_v31 }
 0x223   : > { %1032 = vrot.lane.b32.xlu1 %v977_v43, %s2619_s26  ;;  %1034 = vrot.lane.b32.xlu0 %v985_v58, %s2619_s26 }
 0x225   : > { %2193 = vmatpush3.bf16.msra.mxu1 %v2522_v32 }
 0x226   : > { %2232 = vmatprep.subr.bf16.mxu1 %v3162_v10 }
 0x279   : > { %v1007_v15 = vpop.permute.xlu1 %1006  ;;  %v1005_v16 = vpop.permute.xlu0 %1004 }
 0x27a   : > { %v3093_v21 = vsel %vm715_vm4, %v2807_v50, %v1007_v15  ;;  %v3097_v11 = vsel %vm715_vm4, %v2804_v49, %v1005_v16 }
 0x27b   : > { %v1135_v7 = vrot.slane %v3093_v21, 2  ;;  %v1134_v22 = vrot.slane %v3097_v11, 2  ;;  %v1088_v23 = vrot.slane %v3093_v21, 1  ;;  %v1087_v50 = vrot.slane %v3097_v11, 1 }
 0x27d   : > { %v1009_v26 = vpop.permute.xlu1 %1008  ;;  %v1011_v30 = vpop.permute.xlu0 %1010  ;;  %v1136_v49 = vsel %vm603_vm2, %v1134_v22, %v1135_v7 }
 0x27e   : > { %v3116_v33 = vsel %vm715_vm4, %v2827_v4, %v1009_v26  ;;  %v3120_v36 = vsel %vm715_vm4, %v2830_v5, %v1011_v30  ;;  %v2400_v37 = vpack.i.bf16 %v1136_v49, %v1132_v34  ;;  %v1089_v5 = vsel %vm555_vm3, %v1087_v50, %v1088_v23 }
 0x27f   : > { %v1090_v38 = vrot.slane %v3116_v33, 1  ;;  %v1137_v39 = vrot.slane %v3116_v33, 2  ;;  %v1091_v40 = vrot.slane %v3120_v36, 1  ;;  %v1138_v41 = vrot.slane %v3120_v36, 2 }
 0x280   : > { %2401 = vrot.lane.b32.xlu1 %v2400_v37, %s2620_s28  ;;  %v2395_v4 = vpack.i.bf16 %v3116_v33, %v3097_v11  ;;  %v2405_v58 = vpack.i.bf16 %v1089_v5, %v1085_v51 }
 0x281   : > { %v1013_v44 = vpop.permute.xlu1 %1012  ;;  %v1015_v47 = vpop.permute.xlu0 %1014  ;;  %v1092_v48 = vsel %vm555_vm3, %v1090_v38, %v1091_v40  ;;  %v1139_v43 = vsel %vm603_vm2, %v1137_v39, %v1138_v41 }
 0x282   : > { %v3134_v52 = vsel %vm715_vm4, %v2833_v9, %v1013_v44  ;;  %2396 = vrot.lane.b32.xlu0 %v2395_v4, %s3529_s20  ;;  %v3139_v54 = vsel %vm715_vm4, %v2821_v0, %v1015_v47  ;;  %v2410_v6 = vpack.i.bf16 %v1092_v48, %v1089_v5  ;;  %v2415_v63 = vpack.i.bf16 %v1139_v43, %v1136_v49 }
 0x283   : > { %v1140_v55 = vrot.slane %v3134_v52, 2  ;;  %v1141_v35 = vrot.slane %v3139_v54, 2  ;;  %v1093_v28 = vrot.slane %v3134_v52, 1  ;;  %v1094_v9 = vrot.slane %v3139_v54, 1 }
 0x284   : > { %2411 = vrot.lane.b32.xlu1 %v2410_v6, %s3530_s14 }
 0x285   : > { %v1017_v59 = vpop.permute.xlu1 %1016  ;;  %v1019_v60 = vpop.permute.xlu0 %1018  ;;  %v1142_v61 = vsel %vm603_vm2, %v1140_v55, %v1141_v35  ;;  %v1095_v13 = vsel %vm555_vm3, %v1093_v28, %v1094_v9 }
 0x286   : > { %v3150_v0 = vsel %vm715_vm4, %v2857_v24, %v1017_v59  ;;  %2406 = vrot.lane.b32.xlu0 %v2405_v58, %s2621_s15  ;;  %v3155_v62 = vsel %vm715_vm4, %v2849_v20, %v1019_v60  ;;  %v2425_v1 = vpack.i.bf16 %v1142_v61, %v1139_v43  ;;  %v2430_v30 = vpack.i.bf16 %v1095_v13, %v1092_v48 }
 0x287   : > { %v1096_v2 = vrot.slane %v3150_v0, 1  ;;  %v1097_v8 = vrot.slane %v3155_v62, 1  ;;  %v1143_v24 = vrot.slane %v3150_v0, 2  ;;  %v1144_v42 = vrot.slane %v3155_v62, 2 }
 0x288   : > { %2416 = vrot.lane.b32.xlu1 %v2415_v63, %s2622_s16  ;;  %v2420_v27 = vpack.i.bf16 %v3150_v0, %v3134_v52 }
 0x289   : > { %v1021_v20 = vpop.permute.xlu1 %1020  ;;  %v1023_v12 = vpop.permute.xlu0 %1022  ;;  %v1098_v15 = vsel %vm555_vm3, %v1096_v2, %v1097_v8 }
 0x28a   : > { %v3172_v16 = vsel %vm715_vm4, %v2860_v25, %v1021_v20  ;;  %2426 = vrot.lane.b32.xlu0 %v2425_v1, %s2620_s28  ;;  %v3177_v19 = vsel %vm715_vm4, %v2865_v29, %v1023_v12  ;;  %v2435_v7 = vpack.i.bf16 %v1098_v15, %v1095_v13  ;;  %v1145_v25 = vsel %vm603_vm2, %v1143_v24, %v1144_v42 }
 0x28b   : > { %v1146_v22 = vrot.slane %v3172_v16, 2  ;;  %v1147_v34 = vrot.slane %v3177_v19, 2  ;;  %v2440_v37 = vpack.i.bf16 %v1145_v25, %v1142_v61  ;;  %v1099_v38 = vrot.slane %v3172_v16, 1 }
 0x28c   : > { %2421 = vrot.lane.b32.xlu1 %v2420_v27, %s3529_s20 }
 0x28d   : > { %v1025_v23 = vpop.permute.xlu1 %1024  ;;  %v1027_v50 = vpop.permute.xlu0 %1026  ;;  %v1148_v32 = vsel %vm603_vm2, %v1146_v22, %v1147_v34 }
 0x28e   : > { %v3187_v26 = vsel %vm715_vm4, %v2888_v45, %v1025_v23  ;;  %2436 = vrot.lane.b32.xlu0 %v2435_v7, %s3530_s14  ;;  %v3192_v29 = vsel %vm715_vm4, %v2891_v46, %v1027_v50  ;;  %v1100_v45 = vrot.slane %v3177_v19, 1  ;;  %v2450_v4 = vpack.i.bf16 %v1148_v32, %v1145_v25 }
 0x28f   : > { %v1102_v49 = vrot.slane %v3187_v26, 1  ;;  %v1103_v31 = vrot.slane %v3192_v29, 1  ;;  %v1149_v44 = vrot.slane %v3187_v26, 2  ;;  %v1150_v47 = vrot.slane %v3192_v29, 2 }
 0x290   : > { %2431 = vrot.lane.b32.xlu1 %v2430_v30, %s2621_s15  ;;  %v2445_v48 = vpack.i.bf16 %v3187_v26, %v3172_v16 }
 0x291   : > { %v1029_v39 = vpop.permute.xlu1 %1028  ;;  %v1031_v40 = vpop.permute.xlu0 %1030  ;;  %v1104_v5 = vsel %vm555_vm3, %v1102_v49, %v1103_v31  ;;  %v1151_v28 = vsel %vm603_vm2, %v1149_v44, %v1150_v47 }
 0x292   : > { %v3202_v46 = vsel %vm715_vm4, %v2901_v56, %v1029_v39  ;;  %2441 = vrot.lane.b32.xlu0 %v2440_v37, %s2622_s16  ;;  %v3207_v41 = vsel %vm715_vm4, %v2904_v57, %v1031_v40  ;;  %v1101_v57 = vsel %vm555_vm3, %v1099_v38, %v1100_v45 }
 0x293   : > { %v1152_v56 = vrot.slane %v3202_v46, 2  ;;  %v1153_v51 = vrot.slane %v3207_v41, 2  ;;  %v2460_v58 = vpack.i.bf16 %v1104_v5, %v1101_v57  ;;  %v2455_v9 = vpack.i.bf16 %v1101_v57, %v1098_v15 }
 0x294   : > { %2451 = vrot.lane.b32.xlu1 %v2450_v4, %s2620_s28  ;;  %v1105_v63 = vrot.slane %v3202_v46, 1 }
 0x295   : > { %v1033_v6 = vpop.permute.xlu1 %1032  ;;  %v1035_v55 = vpop.permute.xlu0 %1034  ;;  %v1154_v61 = vsel %vm603_vm2, %v1152_v56, %v1153_v51 }
 0x296   : > { %v3220_v35 = vsel %vm715_vm4, %v2931_v17, %v1033_v6  ;;  %2446 = vrot.lane.b32.xlu0 %v2445_v48, %s3529_s20  ;;  %v3225_v43 = vsel %vm715_vm4, %v2934_v18, %v1035_v55  ;;  %v2465_v17 = vpack.i.bf16 %v1151_v28, %v1148_v32  ;;  %v1106_v18 = vrot.slane %v3207_v41, 1 }
 0x297   : > { %v1205_v59 = vrot.slane %v3220_v35, 1  ;;  %v1206_v60 = vrot.slane %v3225_v43, 1  ;;  %v2475_v1 = vpack.i.bf16 %v1154_v61, %v1151_v28  ;;  %v1232_v2 = vrot.slane %v3220_v35, 2 }
 0x298   : > { %2461 = vrot.lane.b32.xlu1 %v2460_v58, %s3530_s14  ;;  %v1233_v8 = vrot.slane %v3225_v43, 2  ;;  %v2470_v42 = vpack.i.bf16 %v3220_v35, %v3202_v46  ;;  %v1107_v20 = vsel %vm555_vm3, %v1105_v63, %v1106_v18 }
 0x299   : > { %v1207_v24 = vsel %vm555_vm3, %v1205_v59, %v1206_v60  ;;  %v2480_v15 = vpack.i.bf16 %v1107_v20, %v1104_v5  ;;  %vm1884_vm3 = vcmask 1047559  }
 0x29a   : > { %2456 = vrot.lane.b32.xlu0 %v2455_v9, %s2621_s15  ;;  %v2485_v12 = vpack.i.bf16 %v1207_v24, %v1107_v20  ;;  %v1234_v13 = vsel %vm603_vm2, %v1232_v2, %v1233_v8  ;;  %vm1882_vm2 = vcmask 1046534  }
 0x29b   : > { %v2490_v27 = vpack.i.bf16 %v1234_v13, %v1154_v61 }
 0x29c   : > { %2466 = vrot.lane.b32.xlu1 %v2465_v17, %s2622_s16  ;;  %v2524_v17 = vld [vmem:[%s3516_s5 + $0x88] sm:$0xff]  }
 0x29e   : > { %2476 = vrot.lane.b32.xlu0 %v2475_v1, %s2620_s28  ;;  %s368_s28 = sand.u32 1, %s2603_s23  }
 0x29f   : > { %s2121_s19 = sshll.u32 %s368_s28, 3  ;;  %s2033_s29 = scalar_lea.sflag [#allocation5], %s368_s28 }
 0x2a0   : > { %2471 = vrot.lane.b32.xlu1 %v2470_v42, %s3529_s20  ;;  %s1736_s20 = sld [smem:[#allocation3 + %s2710_s25]]  ;;  %s370_s26 = scalar_lea.vmem [#allocation4], %s2121_s19 }
 0x2a1   : > { %s2046_s17 = sshll.u32 %s370_s26, 4  ;;  %s3471_s17 = int_to_ptr.vmem [resolvable:$true] %s2046_s17 }
 0x2a2   : > { %2486 = vrot.lane.b32.xlu0 %v2485_v12, %s3530_s14  ;;  %s2547_s21 = scalar_lea.vmem %s3471_s17, 128 }
 0x2a3   : > { %p2548_p2 = scmp.ne.s32.totalorder %s3471_s17, %s2547_s21 }
 0x2a4   : > { %2481 = vrot.lane.b32.xlu1 %v2480_v15, %s2621_s15 }
 0x2a5   : > { %p2549_p3 = pnand %p2548_p2, %p2727_p10 }
 0x2a6   : > { %2491 = vrot.lane.b32.xlu0 %v2490_v27, %s2622_s16 }
 0x2a7   : > { %p2550_p4 = pneg %p2549_p3 }
 0x2f2   : > { %v2402_v7 = vpop.permute.xlu1 %2401 }
 0x2f3   : > { %v2403_v34 = vunpack.i.l.bf16 %v2402_v7  ;;  %v2404_v25 = vunpack.i.h.bf16 %v2402_v7 }
 0x2f4   : > { %v2397_v22 = vpop.permute.xlu0 %2396 }
 0x2f5   : > { %v2398_v23 = vunpack.i.l.bf16 %v2397_v22  ;;  %v2399_v30 = vunpack.i.h.bf16 %v2397_v22 }
 0x2f6   : > { %v2412_v50 = vpop.permute.xlu1 %2411 }
 0x2f7   : > { %v2413_v49 = vunpack.i.l.bf16 %v2412_v50  ;;  %v2414_v32 = vunpack.i.h.bf16 %v2412_v50  ;;  %v1276_v39 = vsel %vm490_vm0, %v2403_v34, %v2398_v23  ;;  %v1277_v48 = vsel %vm490_vm0, %v2404_v25, %v2399_v30 }
 0x2f8   : > { %v2407_v31 = vpop.permute.xlu0 %2406 }
 0x2f9   : > { %v2409_v37 = vunpack.i.h.bf16 %v2407_v31  ;;  %v2408_v38 = vunpack.i.l.bf16 %v2407_v31  ;;  %v1284_v56 = vsel %vm724_vm5, %v1276_v39, %v2413_v49  ;;  %v1285_v51 = vsel %vm724_vm5, %v1277_v48, %v2414_v32 }
 0x2fa   : > { %v3248_v45 = vpop.permute.xlu1 %2416 }
 0x2fb   : > { %v1261_v40 = vsel %vm1259_vm7, %v3097_v11, %v2409_v37  ;;  %v1260_v4 = vsel %vm1259_vm7, %v3086_v14, %v2408_v38  ;;  %v2419_v44 = vunpack.i.h.bf16 %v3248_v45  ;;  %v2418_v47 = vunpack.i.l.bf16 %v3248_v45 }
 0x2fc   : > { %v2427_v5 = vpop.permute.xlu0 %2426  ;;  %v1268_v55 = vsel %vm733_vm6, %v1260_v4, %v2403_v34  ;;  %v1269_v57 = vsel %vm733_vm6, %v1261_v40, %v2404_v25 }
 0x2fd   : > { %v1293_v6 = vsel %vm1292_vm8, %v1284_v56, %v2418_v47  ;;  %v1294_v58 = vsel %vm1292_vm8, %v1285_v51, %v2419_v44  ;;  %v1301_v61 = vpack.c.bf16 %v1269_v57, %v1268_v55  ;;  %v2428_v63 = vunpack.i.l.bf16 %v2427_v5 }
 0x2fe   : > { %v2422_v14 = vpop.permute.xlu1 %2421  ;;  %v1302_v9 = vpack.c.bf16 %v1294_v58, %v1293_v6  ;;  %v2429_v18 = vunpack.i.h.bf16 %v2427_v5 }
 0x2ff   : > { %v2423_v28 = vunpack.i.l.bf16 %v2422_v14  ;;  %v2424_v59 = vunpack.i.h.bf16 %v2422_v14 }
 0x300   : > { %v2437_v60 = vpop.permute.xlu0 %2436  ;;  %1508 = vmatprep.mubr.bf16.mxu1 %v1302_v9 }
 0x301   : > { %v2438_v1 = vunpack.i.l.bf16 %v2437_v60  ;;  %1509 = vmatmul.mubr.bf16.vlgmr.msra.gmra.mrb[0].mxu1 %v1301_v61  ;;  %v1278_v8 = vsel %vm490_vm0, %v2428_v63, %v2423_v28  ;;  %v2439_v24 = vunpack.i.h.bf16 %v2437_v60  ;;  %v1279_v12 = vsel %vm490_vm0, %v2429_v18, %v2424_v59 }
 0x302   : > { %v2432_v2 = vpop.permute.xlu1 %2431  ;;  %2233 = vmatpush3.bf16.msra.mxu1 %v3162_v10 }
 0x303   : > { %v2434_v42 = vunpack.i.h.bf16 %v2432_v2  ;;  %v2433_v20 = vunpack.i.l.bf16 %v2432_v2  ;;  %2234 = vmatprep.subr.bf16.mxu1 %v2524_v17  ;;  %v1286_v34 = vsel %vm724_vm5, %v1278_v8, %v2438_v1  ;;  %v1287_v25 = vsel %vm724_vm5, %v1279_v12, %v2439_v24 }
 0x304   : > { %v3274_v13 = vpop.permute.xlu0 %2441 }
 0x305   : > { %v1263_v15 = vsel %vm1259_vm7, %v3134_v52, %v2434_v42  ;;  %v1262_v27 = vsel %vm1259_vm7, %v3116_v33, %v2433_v20  ;;  %v2444_v7 = vunpack.i.h.bf16 %v3274_v13  ;;  %v2443_v22 = vunpack.i.l.bf16 %v3274_v13 }
 0x306   : > { %v2452_v23 = vpop.permute.xlu1 %2451  ;;  %v1270_v10 = vsel %vm733_vm6, %v1262_v27, %v2428_v63  ;;  %v1271_v50 = vsel %vm733_vm6, %v1263_v15, %v2429_v18  ;;  %2235 = vmatpush3.bf16.msra.mxu1 %v2524_v17 }
 0x307   : > { %v1295_v30 = vsel %vm1292_vm8, %v1286_v34, %v2443_v22  ;;  %v1296_v31 = vsel %vm1292_vm8, %v1287_v25, %v2444_v7  ;;  %v1304_v32 = vpack.c.bf16 %v1271_v50, %v1270_v10  ;;  %2256 = vmatprep.subr.bf16.mxu1 %v2617_v53  ;;  %v2453_v38 = vunpack.i.l.bf16 %v2452_v23 }
 0x308   : > { %v2447_v49 = vpop.permute.xlu0 %2446  ;;  %v1305_v37 = vpack.c.bf16 %v1296_v31, %v1295_v30  ;;  %v2454_v4 = vunpack.i.h.bf16 %v2452_v23 }
 0x309   : > { %v2448_v39 = vunpack.i.l.bf16 %v2447_v49  ;;  %v2449_v5 = vunpack.i.h.bf16 %v2447_v49 }
 0x30a   : > { %v2462_v40 = vpop.permute.xlu1 %2461  ;;  %1516 = vmatprep.mubr.bf16.mxu1 %v1305_v37 }
 0x30b   : > { %v2463_v48 = vunpack.i.l.bf16 %v2462_v40  ;;  %1517 = vmatmul.mubr.bf16.gmra.mrb[4].mxu1 %v1304_v32  ;;  %v2464_v51 = vunpack.i.h.bf16 %v2462_v40  ;;  %v1280_v57 = vsel %vm490_vm0, %v2453_v38, %v2448_v39  ;;  %v1281_v60 = vsel %vm490_vm0, %v2454_v4, %v2449_v5 }
 0x30c   : > { %v2457_v56 = vpop.permute.xlu0 %2456 }
 0x30d   : > { %v2459_v6 = vunpack.i.h.bf16 %v2457_v56  ;;  %v2458_v55 = vunpack.i.l.bf16 %v2457_v56  ;;  %v1288_v61 = vsel %vm724_vm5, %v1280_v57, %v2463_v48  ;;  %v1289_v63 = vsel %vm724_vm5, %v1281_v60, %v2464_v51 }
 0x30e   : > { %v2467_v14 = vpop.permute.xlu1 %2466 }
 0x30f   : > { %v1265_v58 = vsel %vm1259_vm7, %v3172_v16, %v2459_v6  ;;  %v1264_v28 = vsel %vm1259_vm7, %v3150_v0, %v2458_v55  ;;  %v2469_v9 = vunpack.i.h.bf16 %v2467_v14  ;;  %v2468_v59 = vunpack.i.l.bf16 %v2467_v14 }
 0x310   : > { %v2477_v17 = vpop.permute.xlu0 %2476  ;;  %v1272_v1 = vsel %vm733_vm6, %v1264_v28, %v2453_v38  ;;  %v1273_v2 = vsel %vm733_vm6, %v1265_v58, %v2454_v4  ;;  %v1303_v58 = vpack.c.bf16 %v2419_v44, %v2418_v47  ;;  %v1306_v28 = vpack.c.bf16 %v2444_v7, %v2443_v22 }
 0x311   : > { %v1297_v18 = vsel %vm1292_vm8, %v1288_v61, %v2468_v59  ;;  %v1298_v24 = vsel %vm1292_vm8, %v1289_v63, %v2469_v9  ;;  %v1307_v27 = vpack.c.bf16 %v1273_v2, %v1272_v1  ;;  %v2479_v34 = vunpack.i.h.bf16 %v2477_v17 }
 0x312   : > { %v2472_v8 = vpop.permute.xlu1 %2471  ;;  %v1308_v12 = vpack.c.bf16 %v1298_v24, %v1297_v18  ;;  %v2478_v23 = vunpack.i.l.bf16 %v2477_v17  ;;  %v1309_v60 = vpack.c.bf16 %v2469_v9, %v2468_v59 }
 0x313   : > { %v2474_v42 = vunpack.i.h.bf16 %v2472_v8  ;;  %v2473_v20 = vunpack.i.l.bf16 %v2472_v8 }
 0x314   : > { %v2487_v15 = vpop.permute.xlu0 %2486  ;;  %1524 = vmatprep.mubr.bf16.mxu1 %v1308_v12 }
 0x315   : > { %v2489_v10 = vunpack.i.h.bf16 %v2487_v15  ;;  %v2488_v50 = vunpack.i.l.bf16 %v2487_v15  ;;  %1525 = vmatmul.mubr.bf16.gmra.mrb[8].mxu1 %v1307_v27  ;;  %v1282_v30 = vsel %vm490_vm0, %v2478_v23, %v2473_v20  ;;  %v1283_v49 = vsel %vm490_vm0, %v2479_v34, %v2474_v42 }
 0x316   : > { %v2482_v25 = vpop.permute.xlu1 %2481  ;;  %vm1878_vm0 = vcmask 1044484  }
 0x317   : > { %v2484_v31 = vunpack.i.h.bf16 %v2482_v25  ;;  %v2483_v32 = vunpack.i.l.bf16 %v2482_v25  ;;  %v1290_v5 = vsel %vm724_vm5, %v1282_v30, %v2488_v50  ;;  %v1291_v48 = vsel %vm724_vm5, %v1283_v49, %v2489_v10  ;;  %v2141_v25 = vld [vmem:[%s3517_s6] ss:$0 sm:$0xff] }
 0x318   : > { %v2492_v37 = vpop.permute.xlu0 %2491 }
 0x319   : > { %v1267_v38 = vsel %vm1259_vm7, %v3202_v46, %v2484_v31  ;;  %v1266_v39 = vsel %vm1259_vm7, %v3187_v26, %v2483_v32  ;;  %v2494_v40 = vunpack.i.h.bf16 %v2492_v37  ;;  %v2493_v4 = vunpack.i.l.bf16 %v2492_v37 }
 0x31a   : > { %v1274_v56 = vsel %vm733_vm6, %v1266_v39, %v2478_v23  ;;  %v1275_v51 = vsel %vm733_vm6, %v1267_v38, %v2479_v34 }
 0x31b   : > { %v1299_v6 = vsel %vm1292_vm8, %v1290_v5, %v2493_v4  ;;  %v1300_v55 = vsel %vm1292_vm8, %v1291_v48, %v2494_v40  ;;  %v1310_v57 = vpack.c.bf16 %v1275_v51, %v1274_v56  ;;  %v1312_v61 = vpack.c.bf16 %v2494_v40, %v2493_v4 }
 0x31c   : > { %v1311_v14 = vpack.c.bf16 %v1300_v55, %v1299_v6 }
 0x31e   : > { %1532 = vmatprep.mubr.bf16.mxu1 %v1311_v14 }
 0x31f   : > { %1533 = vmatmul.mubr.bf16.gmra.mrb[12].mxu1 %v1310_v57 }
 0x320   : > { %2236 = vmatprep.mubr.msk.bf16.mxu1 %vm715_vm4, %v1303_v58 }
 0x327   : > { %2237 = vmatmul.mubr.msk.bf16.vlgmr.msra.gmra.mrb[16].mxu1 %vm715_vm4, %v1306_v28 }
 0x328   : > { %2240 = vmatprep.mubr.msk.bf16.mxu1 %vm715_vm4, %v1309_v60 }
 0x32f   : > { %2241 = vmatmul.mubr.msk.bf16.gmra.mrb[20].mxu1 %vm715_vm4, %v1312_v61 }
 0x330   : > { %2260 = vmatprep.mubr.msk.bf16.mxu1 %vm2623_vm9, %v2617_v53 }
 0x3d4   : > { %v2194_v17 = vpop.f32.mrb[0].mxu1 }
 0x3d5   : > { %v2195_v45 = vpop.f32.mrb[1].mxu1 }
 0x3d6   : > { %v2196_v44 = vadd.f32 %v2195_v45, %v2194_v17  ;;  %v2197_v47 = vpop.f32.mrb[2].mxu1 }
 0x3d7   : > { %v2198_v63 = vpop.f32.mrb[3].mxu1 }
 0x3d8   : > { %v2199_v18 = vadd.f32 %v2198_v63, %v2197_v47  ;;  %v1511_v31 = vadd.f32 %v2196_v44, %v2141_v25 }
 0x3da   : > { %v1514_v4 = vadd.f32 %v2199_v18, %v2141_v25 }
 0x3de   : > { %v2200_v1 = vpop.f32.mrb[4].mxu1 }
 0x3df   : > { %v2201_v2 = vpop.f32.mrb[5].mxu1 }
 0x3e0   : > { %v2202_v8 = vadd.f32 %v2201_v2, %v2200_v1  ;;  %v2203_v24 = vpop.f32.mrb[6].mxu1 }
 0x3e1   : > { %v2204_v13 = vpop.f32.mrb[7].mxu1 }
 0x3e2   : > { %v2205_v7 = vadd.f32 %v2204_v13, %v2203_v24  ;;  %v1519_v30 = vadd.f32 %v2202_v8, %v2141_v25 }
 0x3e4   : > { %v1522_v38 = vadd.f32 %v2205_v7, %v2141_v25 }
 0x3e8   : > { %v2206_v22 = vpop.f32.mrb[8].mxu1 }
 0x3e9   : > { %v2207_v9 = vpop.f32.mrb[9].mxu1 }
 0x3ea   : > { %v2208_v59 = vadd.f32 %v2207_v9, %v2206_v22  ;;  %v2209_v42 = vpop.f32.mrb[10].mxu1 }
 0x3eb   : > { %v2210_v20 = vpop.f32.mrb[11].mxu1 }
 0x3ec   : > { %v2211_v12 = vadd.f32 %v2210_v20, %v2209_v42  ;;  %v1527_v17 = vadd.f32 %v2208_v59, %v2141_v25 }
 0x3ee   : > { %v1530_v2 = vadd.f32 %v2211_v12, %v2141_v25 }
 0x3f2   : > { %v2212_v15 = vpop.f32.mrb[12].mxu1 }
 0x3f3   : > { %v2213_v27 = vpop.f32.mrb[13].mxu1 }
 0x3f4   : > { %v2214_v34 = vadd.f32 %v2213_v27, %v2212_v15  ;;  %v2215_v23 = vpop.f32.mrb[14].mxu1 }
 0x3f5   : > { %v2216_v10 = vpop.f32.mrb[15].mxu1 }
 0x3f6   : > { %v2217_v50 = vadd.f32 %v2216_v10, %v2215_v23  ;;  %v1535_v57 = vadd.f32 %v2214_v34, %v2141_v25 }
 0x3f8   : > { %v1538_v47 = vadd.f32 %v2217_v50, %v2141_v25 }
 0x3fa   : > { %v2238_v49 = vpop.f32.mrb[16].mxu1 }
 0x3fb   : > { %v1584_v32 = vadd.f32 %v2238_v49, %v1519_v30  ;;  %v1575_v37 = vpop.f32.mrb[17].mxu1 }
 0x3fc   : > { %v1576_v39 = vadd.f32 %v1575_v37, %v1511_v31  ;;  %v2239_v40 = vpop.f32.mrb[18].mxu1 }
 0x3fd   : > { %v1608_v5 = vmax.f32 %v1584_v32, 0.0  ;;  %v1587_v48 = vadd.f32 %v2239_v40, %v1522_v38  ;;  %v1578_v56 = vpop.f32.mrb[19].mxu1 }
 0x3fe   : > { %v1606_v51 = vmax.f32 %v1576_v39, 0.0  ;;  %v1579_v6 = vadd.f32 %v1578_v56, %v1514_v4  ;;  %v2525_v4 = vld [vmem:[%s3518_s7] sm:$0xff]   ;;  %v2526_v56 = vld [vmem:[%s3518_s7 + $0x8] sm:$0xff]  }
 0x3ff   : > { %v1624_v55 = vrot.slane %v1608_v5, 7  ;;  %v1609_v58 = vmax.f32 %v1587_v48, 0.0  ;;  %2245 = vmatpush3.bf16.msra.mxu0 %v2525_v4 }
 0x400   : > { %v1622_v14 = vrot.slane %v1606_v51, 7  ;;  %v1607_v63 = vmax.f32 %v1579_v6, 0.0  ;;  %2246 = vmatprep.subr.bf16.mxu0 %v2617_v53  ;;  %v2527_v51 = vld [vmem:[%s3518_s7 + $0x10] sm:$0xff]   ;;  %v2528_v6 = vld [vmem:[%s3518_s7 + $0x18] sm:$0xff]  }
 0x401   : > { %v1648_v28 = vsel %vm523_vm1, %v1624_v55, 0.0  ;;  %v1640_v60 = vsel %vm523_vm1, 0.0, %v1624_v55  ;;  %v1625_v8 = vrot.slane %v1609_v58, 7  ;;  %v2529_v55 = vld [vmem:[%s3520_s9] sm:$0xff]   ;;  %v2624_v58 = vmov -inf  }
 0x402   : > { %v2242_v61 = vpop.f32.mrb[20].mxu1  ;;  %1680 = vrot.lane.b32.xlu0 %v1648_v28, %s2621_s15  ;;  %1678 = vrot.lane.b32.xlu1 %v1640_v60, %s2621_s15  ;;  %v1646_v7 = vsel %vm523_vm1, %v1622_v14, 0.0  ;;  %v1638_v22 = vsel %vm523_vm1, 0.0, %v1622_v14  ;;  %v1623_v59 = vrot.slane %v1607_v63, 7  ;;  %v1737_v14 = vstv %s1736_s20 }
 0x403   : > { %v1600_v45 = vadd.f32 %v2242_v61, %v1535_v57  ;;  %v1591_v44 = vpop.f32.mrb[21].mxu1  ;;  %v1649_v20 = vsel %vm523_vm1, %v1625_v8, 0.0  ;;  %v1641_v15 = vsel %vm523_vm1, 0.0, %v1625_v8  ;;  %2247 = vmatpush3.bf16.msra.mxu0 %v2526_v56  ;;  %2257 = vmatpush3.bf16.msra.mxu1 %v2529_v55  ;;  %v2530_v57 = vld [vmem:[%s3520_s9 + $0x8] sm:$0xff]   ;;  %vm1738_vm10 = vcmp.lt.s32.totalorder %v2741_v3, %v1737_v14 }
 0x404   : > { %v1592_v18 = vadd.f32 %v1591_v44, %v1527_v17  ;;  %v2243_v1 = vpop.f32.mrb[22].mxu1  ;;  %v1647_v34 = vsel %vm523_vm1, %v1623_v59, 0.0  ;;  %v1639_v23 = vsel %vm523_vm1, 0.0, %v1623_v59  ;;  %2248 = vmatprep.subr.bf16.mxu0 %v2617_v53  ;;  %2258 = vmatprep.subr.bf16.mxu1 %v2617_v53  ;;  %v1739_v28 = vsel %vm1738_vm10, 0.0, %v2624_v58 }
 0x405   : > { %v1603_v24 = vadd.f32 %v2243_v1, %v1538_v47  ;;  %v1594_v13 = vpop.f32.mrb[23].mxu1  ;;  %v1612_v42 = vmax.f32 %v1600_v45, 0.0  ;;  %v3390_v60 = vrot.slane %v1739_v28, 7 }
 0x406   : > { %v1595_v9 = vadd.f32 %v1594_v13, %v1530_v2  ;;  %1672 = vrot.lane.b32.xlu0 %v1646_v7, %s2621_s15  ;;  %1670 = vrot.lane.b32.xlu1 %v1638_v22, %s2621_s15  ;;  %v1610_v27 = vmax.f32 %v1592_v18, 0.0 }
 0x407   : > { %v1628_v12 = vrot.slane %v1612_v42, 7  ;;  %v1613_v49 = vmax.f32 %v1603_v24, 0.0  ;;  %2249 = vmatpush3.bf16.msra.mxu0 %v2527_v51  ;;  %2259 = vmatpush3.bf16.msra.mxu1 %v2530_v57 }
 0x408   : > { %v1626_v10 = vrot.slane %v1610_v27, 7  ;;  %v1611_v50 = vmax.f32 %v1595_v9, 0.0  ;;  %2250 = vmatprep.subr.bf16.mxu0 %v2617_v53 }
 0x409   : > { %v1652_v25 = vsel %vm523_vm1, %v1628_v12, 0.0  ;;  %v1644_v30 = vsel %vm523_vm1, 0.0, %v1628_v12  ;;  %v1629_v38 = vrot.slane %v1613_v49, 7 }
 0x40a   : > { %1684 = vrot.lane.b32.xlu0 %v1649_v20, %s2621_s15  ;;  %1682 = vrot.lane.b32.xlu1 %v1641_v15, %s2621_s15  ;;  %v1627_v31 = vrot.slane %v1611_v50, 7  ;;  %v1650_v32 = vsel %vm523_vm1, %v1626_v10, 0.0  ;;  %v1642_v37 = vsel %vm523_vm1, 0.0, %v1626_v10 }
 0x40b   : > { %v1653_v5 = vsel %vm523_vm1, %v1629_v38, 0.0  ;;  %v1645_v48 = vsel %vm523_vm1, 0.0, %v1629_v38  ;;  %2251 = vmatpush3.bf16.msra.mxu0 %v2528_v6 }
 0x40c   : > { %v1651_v39 = vsel %vm523_vm1, %v1627_v31, 0.0  ;;  %v1643_v40 = vsel %vm523_vm1, 0.0, %v1627_v31  ;;  %vm1880_vm1 = vcmask 1045509  }
 0x40e   : > { %1676 = vrot.lane.b32.xlu0 %v1647_v34, %s2621_s15  ;;  %1674 = vrot.lane.b32.xlu1 %v1639_v23, %s2621_s15 }
 0x412   : > { %1696 = vrot.lane.b32.xlu0 %v1652_v25, %s2621_s15  ;;  %1694 = vrot.lane.b32.xlu1 %v1644_v30, %s2621_s15 }
 0x416   : > { %1688 = vrot.lane.b32.xlu0 %v1650_v32, %s2621_s15  ;;  %1686 = vrot.lane.b32.xlu1 %v1642_v37, %s2621_s15 }
 0x41a   : > { %1692 = vrot.lane.b32.xlu0 %v1651_v39, %s2621_s15  ;;  %1690 = vrot.lane.b32.xlu1 %v1643_v40, %s2621_s15 }
 0x41e   : > { %1700 = vrot.lane.b32.xlu0 %v1653_v5, %s2621_s15  ;;  %1698 = vrot.lane.b32.xlu1 %v1645_v48, %s2621_s15  ;;  %s2175_s15 = sshll.u32 %s2710_s25, 7  ;;  %s2625_s25 = smov [#allocation4]  }
 0x41f   : > { %s3469_s14 = scalar_lea.hbm %s3522_s11, %s2175_s15  ;;  %s2551_s16 = sshll.u32 %s2625_s25, 4  ;;  %s2552_s16 = int_to_ptr.vmem [resolvable:$false] %s2551_s16 }
 0x420   : > { %s2553_s19 = scalar_lea.vmem %s2552_s16, 256  ;;  %p2554_p5 = scmp.lt.s32.totalorder %s3471_s17, %s2552_s16 }
 0x421   : > { %p2555_p6 = scmp.lt.s32.totalorder %s2553_s19, %s2547_s21 }
 0x423   : > { %p2556_p7 = por %p2555_p6, %p2554_p5 }
 0x425   : > { %p2557_p8 = pnand %p2556_p7, %p2550_p4 }
 0x474   : > { %v1681_v61 = vpop.permute.xlu0 %1680  ;;  %v1679_v17 = vpop.permute.xlu1 %1678 }
 0x475   : > { %v1723_v45 = vsel %vm1259_vm7, %v3139_v54, %v1681_v61  ;;  %v1722_v44 = vsel %vm1259_vm7, %v3134_v52, %v1679_v17 }
 0x476   : > { %v1748_v47 = vadd.f32 %v3390_v60, %v1723_v45  ;;  %v1747_v53 = vadd.f32 %v3390_v60, %v1722_v44 }
 0x478   : > { %v1673_v63 = vpop.permute.xlu0 %1672  ;;  %v1671_v3 = vpop.permute.xlu1 %1670  ;;  %v1780_v2 = vsel %vm1761_vm11, %v1748_v47, -inf  ;;  %v1779_v54 = vsel %vm1759_vm12, %v1747_v53, -inf }
 0x479   : > { %v1719_v18 = vsel %vm1259_vm7, %v3093_v21, %v1673_v63  ;;  %v1718_v1 = vsel %vm1259_vm7, %v3097_v11, %v1671_v3  ;;  %v1781_v9 = vmax.f32 %v1779_v54, %v1780_v2 }
 0x47a   : > { %v1744_v52 = vadd.f32 %v3390_v60, %v1719_v18  ;;  %v1743_v8 = vadd.f32 %v3390_v60, %v1718_v1 }
 0x47b   : > { %v1782_v10 = vrot.slane %v1781_v9, 4 }
 0x47c   : > { %v1762_v24 = vsel %vm1761_vm11, %v1744_v52, -inf  ;;  %v1760_v13 = vsel %vm1759_vm12, %v1743_v8, -inf  ;;  %v1685_v7 = vpop.permute.xlu0 %1684  ;;  %v1683_v22 = vpop.permute.xlu1 %1682 }
 0x47d   : > { %v1763_v59 = vmax.f32 %v1760_v13, %v1762_v24  ;;  %v1725_v21 = vsel %vm1259_vm7, %v3155_v62, %v1685_v7  ;;  %v1724_v11 = vsel %vm1259_vm7, %v3150_v0, %v1683_v22  ;;  %v1783_v38 = vmax.f32 %v1781_v9, %v1782_v10 }
 0x47e   : > { %v1750_v42 = vadd.f32 %v3390_v60, %v1725_v21  ;;  %v1749_v20 = vadd.f32 %v3390_v60, %v1724_v11 }
 0x47f   : > { %v1764_v15 = vrot.slane %v1763_v59, 4  ;;  %v1784_v57 = vrot.slane %v1783_v38, 2 }
 0x480   : > { %v1789_v12 = vsel %vm1761_vm11, %v1750_v42, -inf  ;;  %v1788_v27 = vsel %vm1759_vm12, %v1749_v20, -inf  ;;  %v1677_v34 = vpop.permute.xlu0 %1676  ;;  %v1675_v23 = vpop.permute.xlu1 %1674 }
 0x481   : > { %v1790_v50 = vmax.f32 %v1788_v27, %v1789_v12  ;;  %v1721_v25 = vsel %vm1259_vm7, %v3120_v36, %v1677_v34  ;;  %v1720_v0 = vsel %vm1259_vm7, %v3116_v33, %v1675_v23  ;;  %v1765_v49 = vmax.f32 %v1763_v59, %v1764_v15 }
 0x482   : > { %v1746_v62 = vadd.f32 %v3390_v60, %v1721_v25  ;;  %v1745_v30 = vadd.f32 %v3390_v60, %v1720_v0  ;;  %v1785_v18 = vmax.f32 %v1783_v38, %v1784_v57 }
 0x483   : > { %v1791_v39 = vrot.slane %v1790_v50, 4  ;;  %v1766_v48 = vrot.slane %v1765_v49, 2 }
 0x484   : > { %v1771_v31 = vsel %vm1761_vm11, %v1746_v62, -inf  ;;  %v1697_v32 = vpop.permute.xlu0 %1696  ;;  %v1695_v37 = vpop.permute.xlu1 %1694  ;;  %v1770_v40 = vsel %vm1759_vm12, %v1745_v30, -inf  ;;  %v1786_v42 = vrot.slane %v1785_v18, 1 }
 0x485   : > { %v1772_v4 = vmax.f32 %v1770_v40, %v1771_v31  ;;  %v1731_v36 = vsel %vm1259_vm7, %v3207_v41, %v1697_v32  ;;  %v1730_v5 = vsel %vm1259_vm7, %v3202_v46, %v1695_v37  ;;  %v1792_v14 = vmax.f32 %v1790_v50, %v1791_v39 }
 0x486   : > { %v1756_v33 = vadd.f32 %v3390_v60, %v1731_v36  ;;  %v1755_v51 = vadd.f32 %v3390_v60, %v1730_v5  ;;  %v1767_v44 = vmax.f32 %v1765_v49, %v1766_v48  ;;  %v1787_v32 = vmax.f32 %v1785_v18, %v1786_v42 }
 0x487   : > { %v1773_v56 = vrot.slane %v1772_v4, 4  ;;  %v1793_v1 = vrot.slane %v1792_v14, 2 }
 0x488   : > { %v1689_v6 = vpop.permute.xlu0 %1688  ;;  %v1687_v55 = vpop.permute.xlu1 %1686  ;;  %v1816_v58 = vsel %vm1761_vm11, %v1756_v33, -inf  ;;  %v1815_v61 = vsel %vm1759_vm12, %v1755_v51, -inf  ;;  %v1768_v22 = vrot.slane %v1767_v44, 1  ;;  %v1835_v51 = vpack.c.bf16 %v1787_v32, %v1787_v32 }
 0x489   : > { %v1774_v28 = vmax.f32 %v1772_v4, %v1773_v56  ;;  %v1727_v41 = vsel %vm1259_vm7, %v3177_v19, %v1689_v6  ;;  %v1726_v46 = vsel %vm1259_vm7, %v3172_v16, %v1687_v55  ;;  %v1817_v17 = vmax.f32 %v1815_v61, %v1816_v58 }
 0x48a   : > { %v1752_v45 = vadd.f32 %v3390_v60, %v1727_v41  ;;  %v1751_v53 = vadd.f32 %v3390_v60, %v1726_v46  ;;  %v1794_v20 = vmax.f32 %v1792_v14, %v1793_v1  ;;  %v1769_v62 = vmax.f32 %v1767_v44, %v1768_v22 }
 0x48b   : > { %v1775_v47 = vrot.slane %v1774_v28, 2  ;;  %v1818_v2 = vrot.slane %v1817_v17, 4 }
 0x48c   : > { %v1693_v63 = vpop.permute.xlu0 %1692  ;;  %v1691_v3 = vpop.permute.xlu1 %1690  ;;  %v1798_v54 = vsel %vm1761_vm11, %v1752_v45, -inf  ;;  %v1797_v19 = vsel %vm1759_vm12, %v1751_v53, -inf  ;;  %v1795_v37 = vrot.slane %v1794_v20, 1  ;;  %v1833_v36 = vpack.c.bf16 %v1769_v62, %v1769_v62 }
 0x48d   : > { %v1776_v52 = vmax.f32 %v1774_v28, %v1775_v47  ;;  %v1729_v16 = vsel %vm1259_vm7, %v3192_v29, %v1693_v63  ;;  %v1728_v8 = vsel %vm1259_vm7, %v3187_v26, %v1691_v3  ;;  %v1819_v24 = vmax.f32 %v1817_v17, %v1818_v2 }
 0x48e   : > { %v1799_v13 = vmax.f32 %v1797_v19, %v1798_v54  ;;  %v1754_v7 = vadd.f32 %v3390_v60, %v1729_v16  ;;  %v1753_v59 = vadd.f32 %v3390_v60, %v1728_v8  ;;  %v1796_v48 = vmax.f32 %v1794_v20, %v1795_v37 }
 0x48f   : > { %v1777_v9 = vrot.slane %v1776_v52, 1  ;;  %v1820_v23 = vrot.slane %v1819_v24, 2  ;;  %v1864_v14 = vunpack.c.l.b16 %v1833_v36  ;;  %v1866_v45 = vunpack.c.l.b16 %v1835_v51 }
 0x490   : > { %v1701_v21 = vpop.permute.xlu0 %1700  ;;  %v1699_v11 = vpop.permute.xlu1 %1698  ;;  %v1800_v15 = vrot.slane %v1799_v13, 4  ;;  %v1807_v12 = vsel %vm1761_vm11, %v1754_v7, -inf  ;;  %v1806_v29 = vsel %vm1759_vm12, %v1753_v59, -inf  ;;  %v1836_v41 = vpack.c.bf16 %v1796_v48, %v1796_v48 }
 0x491   : > { %v1778_v27 = vmax.f32 %v1776_v52, %v1777_v9  ;;  %v1733_v26 = vsel %vm1259_vm7, %v3225_v43, %v1701_v21  ;;  %v1732_v34 = vsel %vm1259_vm7, %v3220_v35, %v1699_v11  ;;  %v1808_v50 = vmax.f32 %v1806_v29, %v1807_v12  ;;  %v2164_v11 = vld [vmem:[%s3519_s8] ss:$0 sm:$0xff] }
 0x492   : > { %v1801_v10 = vmax.f32 %v1799_v13, %v1800_v15  ;;  %v1758_v25 = vadd.f32 %v3390_v60, %v1733_v26  ;;  %v1757_v0 = vadd.f32 %v3390_v60, %v1732_v34  ;;  %v1821_v39 = vmax.f32 %v1819_v24, %v1820_v23  ;;  %v2170_v26 = vld [vmem:[%s3521_s10] ss:$0 sm:$0xff] }
 0x493   : > { %v1809_v49 = vrot.slane %v1808_v50, 4  ;;  %v1834_v38 = vpack.c.bf16 %v1778_v27, %v1778_v27  ;;  %v1867_v1 = vunpack.c.l.b16 %v1836_v41 }
 0x494   : > { %v1802_v30 = vrot.slane %v1801_v10, 2  ;;  %v1825_v31 = vsel %vm1761_vm11, %v1758_v25, -inf  ;;  %v1824_v43 = vsel %vm1759_vm12, %v1757_v0, -inf  ;;  %v1822_v6 = vrot.slane %v1821_v39, 1 }
 0x495   : > { %v1810_v35 = vmax.f32 %v1808_v50, %v1809_v49  ;;  %v1826_v4 = vmax.f32 %v1824_v43, %v1825_v31  ;;  %v1865_v56 = vunpack.c.l.b16 %v1834_v38 }
 0x496   : > { %v1803_v40 = vmax.f32 %v1801_v10, %v1802_v30  ;;  %v1823_v44 = vmax.f32 %v1821_v39, %v1822_v6 }
 0x497   : > { %v1811_v33 = vrot.slane %v1810_v35, 2  ;;  %v1827_v60 = vrot.slane %v1826_v4, 4  ;;  %v1873_v46 = vsel %vm1872_vm13, %v1865_v56, %v1864_v14 }
 0x498   : > { %v1804_v5 = vrot.slane %v1803_v40, 1  ;;  %v1875_v63 = vsel %vm1874_vm14, %v1866_v45, %v1873_v46  ;;  %v1839_v54 = vpack.c.bf16 %v1823_v44, %v1823_v44 }
 0x499   : > { %v1812_v57 = vmax.f32 %v1810_v35, %v1811_v33  ;;  %v1828_v58 = vmax.f32 %v1826_v4, %v1827_v60  ;;  %v1877_v19 = vsel %vm1876_vm15, %v1867_v1, %v1875_v63 }
 0x49a   : > { %v1805_v55 = vmax.f32 %v1803_v40, %v1804_v5  ;;  %v1870_v7 = vunpack.c.l.b16 %v1839_v54 }
 0x49b   : > { %v1813_v61 = vrot.slane %v1812_v57, 1  ;;  %v1829_v17 = vrot.slane %v1828_v58, 2 }
 0x49c   : > { %v1837_v28 = vpack.c.bf16 %v1805_v55, %v1805_v55 }
 0x49d   : > { %v1814_v47 = vmax.f32 %v1812_v57, %v1813_v61  ;;  %v1830_v53 = vmax.f32 %v1828_v58, %v1829_v17 }
 0x49e   : > { %v1868_v3 = vunpack.c.l.b16 %v1837_v28 }
 0x49f   : > { %v1838_v18 = vpack.c.bf16 %v1814_v47, %v1814_v47  ;;  %v1831_v2 = vrot.slane %v1830_v53, 1 }
 0x4a0   : > { %v1879_v8 = vsel %vm1878_vm0, %v1868_v3, %v1877_v19 }
 0x4a1   : > { %v1869_v52 = vunpack.c.l.b16 %v1838_v18  ;;  %v1832_v16 = vmax.f32 %v1830_v53, %v1831_v2 }
 0x4a3   : > { %v1881_v24 = vsel %vm1880_vm1, %v1869_v52, %v1879_v8  ;;  %v1840_v13 = vpack.c.bf16 %v1832_v16, %v1832_v16 }
 0x4a4   : > { %v1883_v9 = vsel %vm1882_vm2, %v1870_v7, %v1881_v24 }
 0x4a5   : > { %v1871_v22 = vunpack.c.l.b16 %v1840_v13 }
 0x4a7   : > { %v1885_v59 = vsel %vm1884_vm3, %v1871_v22, %v1883_v9 }
 0x4a8   : > { %v1886_v21 = vpack.c.b16 %v1885_v59, %v1885_v59 }
 0x4aa   : > { %2253 = vmatmul.mubr.msk.bf16.vlgmr.msra.gmra.mrb[16].mxu0 %vm724_vm5, %v1886_v21 }
 0x57d   : > { %v1948_v42 = vpop.f32.mrb[16].mxu0 }
 0x57e   : > { %v1949_v20 = vadd.f32 %v2164_v11, %v1948_v42  ;;  %v2254_v15 = vpop.f32.mrb[17].mxu0 }
 0x57f   : > { %v1951_v12 = vpop.f32.mrb[18].mxu0 }
 0x580   : > { %v1954_v27 = vpack.c.bf16 %v1949_v20, %v1949_v20  ;;  %v2255_v29 = vpop.f32.mrb[19].mxu0 }
 0x582   : > { %2261 = vmatmul.mubr.msk.bf16.vlgmr.msra.gmra.mrb[24].mxu1 %vm715_vm4, %v1954_v27 }
 0x655   : > { %v2015_v34 = vpop.f32.mrb[24].mxu1 }
 0x656   : > { %v2016_v23 = vadd.f32 %v2170_v26, %v2015_v34  ;;  %v2262_v10 = vpop.f32.mrb[25].mxu1 }
 0x657   : > { %v2018_v50 = vpop.f32.mrb[26].mxu1 }
 0x658   : > { %2021 = vmax.xlane.f32.xlu1 %v2016_v23  ;;  %v2263_v25 = vpop.f32.mrb[27].mxu1 }
 0x6e5   : > { %v2022_v62 = vpop.xlane.xlu1 %2021 }
 0x6e6   : > { %v2023_v0 = vsub.f32 %v2016_v23, %v2022_v62 }
 0x6e8   : > { %v2024_v30 = vmul.f32 1.442695, %v2023_v0 }
 0x6ea   : > { %2531 = vpow2.f32 %v2024_v30 }
 0x6f4   : > { %v2532_v49 = vpop.eup %2531 }
 0x6f5   : > { %2026 = vadd.xlane.f32.xlu0 %v2532_v49 }
 0x782   : > { %v2027_v31 = vpop.xlane.xlu0 %2026 }
 0x783   : > { %2533 = vlog2.f32 %v2027_v31 }
 0x78d   : > { %v2534_v32 = vpop.eup %2533 }
 0x78e   : > { %v2029_v37 = vmul.f32 0.6931472, %v2534_v32 }
 0x790   : > { %v2030_v38 = vsub.f32 %v2023_v0, %v2029_v37 }
 0x792   : > { %2031 = vst [vmem:[%s370_s26] sm:$0xff] %v2030_v38 }
 0x793   : > { %2560 = shalt.err (!%p2557_p8)
}
 0x794   : > { %s2561_s28 = scalar_lea.hbm %s3469_s14, 128  ;;  %s2565_s18 = scalar_lea.hbm %s3522_s11, 256 }
 0x795   : > { %p2562_p9 = scmp.ne.s32.totalorder %s3469_s14, %s2561_s28  ;;  %p2566_p0 = scmp.lt.u32.totalorder %s3469_s14, %s3522_s11 }
 0x796   : > { %p2567_p1 = scmp.lt.u32.totalorder %s2565_s18, %s2561_s28  ;;  %p2569_p3 = scmp.lt.u32.totalorder %s2561_s28, %s3469_s14 }
 0x797   : > { %p2563_p12 = pnand %p2562_p9, %p2727_p10 }
 0x798   : > { %p2568_p2 = por %p2567_p1, %p2566_p0 }
 0x799   : > { %p2564_p13 = pneg %p2563_p12 }
 0x79a   : > { %p2570_p4 = por %p2569_p3, %p2568_p2 }
 0x79c   : > { %p2571_p5 = pnand %p2570_p4, %p2564_p13 }
 0x79e   : > { %2574 = shalt.err (!%p2571_p5)
}
 0x79f   : > { %2264 = dma.vmem_to_hbm [thread:$0]  (%p2727_p10), %s3471_s17, 128, %s3469_s14, %s2033_s29  }
 0x7a0 PF: > { %p2270_p6 = scmp.ge.s32.totalorder %s2611_s24, 2  ;;  %s2058_s21 = sand.u32 1, %s2599_s22  }
 0x7a1   : > { %s2059_s16 = scalar_lea.sflag [#allocation5], %s2058_s21 }
 0x7a2   : > { %p2267_p7 = pnand %p2270_p6, %p2731_p11 }
 0x7a4   : > { %2594 = dma.done.wait (!%p2267_p7), %s2059_s16, 128  }
 0x7a5   : > { %2596 = vsyncadd (!%p2267_p7), %s2059_s16, 4294967168  ;;  %p27_p8 = scmp.ge.s32.totalorder %s2714_s27, 4   ;;  %s3531_s22 = smov %s2603_s23 }
 0x7a6   : > { %s3532_s23 = smov %s2607_s0  ;;  %s3533_s0 = smov %s2725_s30 }
 0x7a7   : > { %s3534_s24 = smov %s2714_s27  ;;  %29 = sbr.rel (!%p27_p8) target bundleno = 18 (0x12), region = 98 }
 0x7ae   :  { %2064 = vsyncpa [#allocation5], 1 }
 0x7af   :  { %2066 = vsyncpa [#allocation5 + $0x1], 1 }

</bundles_post_ra>
